<compile_context>
chip_gen: v7x
topology: tpu7x:2x2x1
jax: 0.10.0
libtpu: 0.0.40
codegen_flags: <defaults>
</compile_context>

<pallas_src>
import functools

import numpy as np
import jax
import jax.numpy as jnp
from jax.experimental import pallas as pl
from jax.experimental.pallas import tpu as pltpu


def residual_kernel(x_ref, w3_ref, w1_ref, mask_ref, o_ref, *, width):
    # x_ref   : (Nb, Cin, S)  f32   NCHW input block, spatial flattened on lanes
    # w3_ref  : (9*Crh, Cin)  bf16  3x3 weights, rows ordered (tap, out_ch)
    # w1_ref  : (Cout, Crh)   bf16  1x1 weights
    # mask_ref: (9, S)        f32   per-tap in-image mask at output positions
    # o_ref   : (Nb, Cout, S) f32
    nb_blk, _, s = x_ref.shape
    crh = w1_ref.shape[1]

    w3 = w3_ref[...]
    w1 = w1_ref[...]
    mask = mask_ref[...]

    for nb in range(nb_blk):                                   # short static unroll
        x = x_ref[nb]                                          # (Cin, S) f32
        xr = jnp.maximum(x, 0.0)                               # ReLU in f32 (VPU)

        # All 9 un-shifted tap contributions in one MXU matmul: (9*Crh, S) f32.
        hcat = jnp.dot(w3, xr.astype(jnp.bfloat16),
                       preferred_element_type=jnp.float32)

        # Per-tap spatial shift via lane roll (XLU) + zero-pad border mask
        # (VPU); accumulate in f32.  Tap 4 (dy=dx=0) needs neither.
        acc = hcat[4 * crh:5 * crh, :]                         # (Crh, S) f32
        for t in range(9):
            if t == 4:
                continue
            dy, dx = t // 3 - 1, t % 3 - 1
            off = dy * width + dx                              # source = out + off
            slab = hcat[t * crh:(t + 1) * crh, :]              # (Crh, S) f32
            rolled = pltpu.roll(slab, shift=(-off) % s, axis=1)
            acc = acc + rolled * mask[t:t + 1, :]

        hidden = jnp.maximum(acc, 0.0)                         # ReLU in f32
        y = jnp.dot(w1, hidden.astype(jnp.bfloat16),           # (Cout, S) f32
                    preferred_element_type=jnp.float32)

        # Residual add in f32; store is lane-dense (S multiple of 128).
        o_ref[nb] = (x + y).astype(o_ref.dtype)


def _tap_masks(H, W):
    """mask[t, r] = 1 iff 3x3 tap t at output position r reads an in-image
    input (i.e. the tap does not fall into the zero padding)."""
    S = H * W
    r = np.arange(S)
    h, w = r // W, r % W
    m = np.zeros((9, S), np.float32)
    t = 0
    for dy in (-1, 0, 1):
        for dx in (-1, 0, 1):
            ok = (h + dy >= 0) & (h + dy < H) & (w + dx >= 0) & (w + dx < W)
            m[t, ok] = 1.0
            t += 1
    return m


def residual_forward(x, w3, w1, block_n=2):
    """x: (N, Cin, H, W) NCHW;  w3: (Crh, Cin, 3, 3) OIHW;  w1: (Cout, Crh, 1, 1)."""
    N, Cin, H, W = x.shape
    Crh = w3.shape[0]
    Cout = w1.shape[0]
    assert Cout == Cin, "residual add requires num_hiddens == in_channels"
    S = H * W

    # Largest batch block <= block_n dividing N.  block_n=2 keeps grid >= 4
    # for N >= 8 so both v7x TensorCores get pipelined steps.
    nb = max(d for d in range(1, min(block_n, N) + 1) if N % d == 0)

    xf = x.reshape(N, Cin, S)                                  # free reshape, stays f32
    w3all = (jnp.transpose(w3, (2, 3, 0, 1))                   # (3,3,Crh,Cin)
             .reshape(9 * Crh, Cin).astype(jnp.bfloat16))      # rows = (tap, out_ch)
    w1m = w1.reshape(Cout, Crh).astype(jnp.bfloat16)
    mask = jnp.asarray(_tap_masks(H, W))                       # (9, S) f32, ~9 KiB

    out = pl.pallas_call(
        functools.partial(residual_kernel, width=W),
        out_shape=jax.ShapeDtypeStruct((N, Cout, S), x.dtype),
        grid=(N // nb,),
        in_specs=[
            pl.BlockSpec((nb, Cin, S), lambda b: (b, 0, 0)),
            pl.BlockSpec((9 * Crh, Cin), lambda b: (0, 0)),
            pl.BlockSpec((Cout, Crh), lambda b: (0, 0)),
            pl.BlockSpec((9, S), lambda b: (0, 0)),
        ],
        out_specs=pl.BlockSpec((nb, Cout, S), lambda b: (b, 0, 0)),
        compiler_params=pltpu.CompilerParams(
            dimension_semantics=("parallel",)),
    )(xf, w3all, w1m, mask)

    return out.reshape(N, Cout, H, W)


def residual_block_reference(x, w3, w1):
    """Conv path only (pure-JAX lax convs, NCHW / OIHW like PyTorch)."""
    h = jax.nn.relu(x)
    h = jax.lax.conv_general_dilated(
        h, w3, window_strides=(1, 1), padding=((1, 1), (1, 1)),
        dimension_numbers=("NCHW", "OIHW", "NCHW"))
    h = jax.nn.relu(h)
    h = jax.lax.conv_general_dilated(
        h, w1, window_strides=(1, 1), padding=((0, 0), (0, 0)),
        dimension_numbers=("NCHW", "OIHW", "NCHW"))
    return h


def residual_reference(x, w3, w1):
    return x + residual_block_reference(x, w3, w1)


if __name__ == "__main__":
    # Shapes consistent with the module: num_hiddens = 128 (in == out so the
    # residual add is valid), num_residual_hiddens = 32; small batch/spatial.
    batch = 8
    num_hiddens = 128
    num_residual_hiddens = 32
    H = W = 16

    key = jax.random.PRNGKey(0)
    kx, k3, k1 = jax.random.split(key, 3)

    x = jax.random.normal(kx, (batch, num_hiddens, H, W), dtype=jnp.float32)
    # PyTorch-layout weights: Conv2d(Cin->Crh, 3x3) is (Crh, Cin, 3, 3),
    # Conv2d(Crh->Cout, 1x1) is (Cout, Crh, 1, 1); both bias=False.
    w3 = jax.random.normal(
        k3, (num_residual_hiddens, num_hiddens, 3, 3), dtype=jnp.float32) * 0.05
    w1 = jax.random.normal(
        k1, (num_hiddens, num_residual_hiddens, 1, 1), dtype=jnp.float32) * 0.05

    out = jax.jit(residual_forward)(x, w3, w1)
    jax.block_until_ready(out)
    assert out.shape == x.shape and out.dtype == x.dtype

    # Reference: conv path on bf16-rounded activations/weights (the kernel
    # feeds the MXU in bf16, accumulates in f32); residual add uses the
    # un-rounded f32 x, exactly as the kernel does.
    bf = lambda a: a.astype(jnp.bfloat16).astype(jnp.float32)
    ref = x + residual_block_reference(bf(x), bf(w3), bf(w1))

    diff = jnp.max(jnp.abs(out - ref))
    assert jnp.allclose(out, ref, atol=5e-2, rtol=5e-2), (
        f"max abs diff = {float(diff)}")

    print("KERNEL_OK")
</pallas_src>

<mosaic_0001>
module attributes {stable_mosaic.version = 11 : i64} {
  func.func @residual_kernel(%arg0: i32, %arg1: memref<2x128x256xf32, #tpu.memory_space<vmem>>, %arg2: memref<288x128xbf16, #tpu.memory_space<vmem>>, %arg3: memref<128x32xbf16, #tpu.memory_space<vmem>>, %arg4: memref<9x256xf32, #tpu.memory_space<vmem>>, %arg5: memref<2x128x256xf32, #tpu.memory_space<vmem>>) attributes {dimension_semantics = [#tpu.dimension_semantics<parallel>], iteration_bounds = array<i64: 4>, scalar_prefetch = 0 : i64, scratch_operands = 0 : i64, tpu.core_type = #tpu.core_type<tc>, window_params = [{transform_indices = @transform_0, window_bounds = array<i64: 2, 128, 256>}, {pipeline_mode = #tpu.pipeline_mode<synchronous>, transform_indices = @transform_1, window_bounds = array<i64: 288, 128>}, {pipeline_mode = #tpu.pipeline_mode<synchronous>, transform_indices = @transform_2, window_bounds = array<i64: 128, 32>}, {pipeline_mode = #tpu.pipeline_mode<synchronous>, transform_indices = @transform_3, window_bounds = array<i64: 9, 256>}, {transform_indices = @transform_4, window_bounds = array<i64: 2, 128, 256>}]} {
    %c0 = arith.constant 0 : index
    %c0_0 = arith.constant 0 : index
    %0 = vector.load %arg2[%c0, %c0_0] : memref<288x128xbf16, #tpu.memory_space<vmem>>, vector<288x128xbf16>
    %c0_1 = arith.constant 0 : index
    %c0_2 = arith.constant 0 : index
    %1 = vector.load %arg3[%c0_1, %c0_2] : memref<128x32xbf16, #tpu.memory_space<vmem>>, vector<128x32xbf16>
    %c0_3 = arith.constant 0 : index
    %c0_4 = arith.constant 0 : index
    %2 = vector.load %arg4[%c0_3, %c0_4] : memref<9x256xf32, #tpu.memory_space<vmem>>, vector<9x256xf32>
    %c0_5 = arith.constant 0 : index
    %c0_6 = arith.constant 0 : index
    %c0_7 = arith.constant 0 : index
    %3 = vector.load %arg1[%c0_5, %c0_6, %c0_7] : memref<2x128x256xf32, #tpu.memory_space<vmem>>, vector<1x128x256xf32>
    %4 = vector.shape_cast %3 : vector<1x128x256xf32> to vector<128x256xf32>
    %cst = arith.constant 0.000000e+00 : f32
    %5 = vector.broadcast %cst : f32 to vector<128x256xf32>
    %6 = arith.maximumf %4, %5 : vector<128x256xf32>
    %7 = arith.truncf %6 : vector<128x256xf32> to vector<128x256xbf16>
    %cst_8 = arith.constant dense<0.000000e+00> : vector<288x256xf32>
    %8 = tpu.matmul %0, %7, %cst_8 {dimension_numbers = #tpu.dot_dimension_numbers<[1], [0], [0], [1], [0, 0, 1, 1], [], []>} : vector<288x128xbf16>, vector<128x256xbf16>, vector<288x256xf32> -> vector<288x256xf32>
    %9 = vector.extract_strided_slice %8 {offsets = [128, 0], sizes = [32, 256], strides = [1, 1]} : vector<288x256xf32> to vector<32x256xf32>
    %10 = vector.extract_strided_slice %8 {offsets = [0, 0], sizes = [32, 256], strides = [1, 1]} : vector<288x256xf32> to vector<32x256xf32>
    %c17_i32 = arith.constant 17 : i32
    %11 = tpu.dynamic_rotate %10 by %c17_i32 dim 1 : vector<32x256xf32>, i32 -> vector<32x256xf32>
    %12 = vector.extract_strided_slice %2 {offsets = [0, 0], sizes = [1, 256], strides = [1, 1]} : vector<9x256xf32> to vector<1x256xf32>
    %13 = vector.broadcast %12 : vector<1x256xf32> to vector<32x256xf32>
    %14 = arith.mulf %11, %13 : vector<32x256xf32>
    %15 = arith.addf %9, %14 : vector<32x256xf32>
    %16 = vector.extract_strided_slice %8 {offsets = [32, 0], sizes = [32, 256], strides = [1, 1]} : vector<288x256xf32> to vector<32x256xf32>
    %c16_i32 = arith.constant 16 : i32
    %17 = tpu.dynamic_rotate %16 by %c16_i32 dim 1 : vector<32x256xf32>, i32 -> vector<32x256xf32>
    %18 = vector.extract_strided_slice %2 {offsets = [1, 0], sizes = [1, 256], strides = [1, 1]} : vector<9x256xf32> to vector<1x256xf32>
    %19 = vector.broadcast %18 : vector<1x256xf32> to vector<32x256xf32>
    %20 = arith.mulf %17, %19 : vector<32x256xf32>
    %21 = arith.addf %15, %20 : vector<32x256xf32>
    %22 = vector.extract_strided_slice %8 {offsets = [64, 0], sizes = [32, 256], strides = [1, 1]} : vector<288x256xf32> to vector<32x256xf32>
    %c15_i32 = arith.constant 15 : i32
    %23 = tpu.dynamic_rotate %22 by %c15_i32 dim 1 : vector<32x256xf32>, i32 -> vector<32x256xf32>
    %24 = vector.extract_strided_slice %2 {offsets = [2, 0], sizes = [1, 256], strides = [1, 1]} : vector<9x256xf32> to vector<1x256xf32>
    %25 = vector.broadcast %24 : vector<1x256xf32> to vector<32x256xf32>
    %26 = arith.mulf %23, %25 : vector<32x256xf32>
    %27 = arith.addf %21, %26 : vector<32x256xf32>
    %28 = vector.extract_strided_slice %8 {offsets = [96, 0], sizes = [32, 256], strides = [1, 1]} : vector<288x256xf32> to vector<32x256xf32>
    %c1_i32 = arith.constant 1 : i32
    %29 = tpu.dynamic_rotate %28 by %c1_i32 dim 1 : vector<32x256xf32>, i32 -> vector<32x256xf32>
    %30 = vector.extract_strided_slice %2 {offsets = [3, 0], sizes = [1, 256], strides = [1, 1]} : vector<9x256xf32> to vector<1x256xf32>
    %31 = vector.broadcast %30 : vector<1x256xf32> to vector<32x256xf32>
    %32 = arith.mulf %29, %31 : vector<32x256xf32>
    %33 = arith.addf %27, %32 : vector<32x256xf32>
    %34 = vector.extract_strided_slice %8 {offsets = [160, 0], sizes = [32, 256], strides = [1, 1]} : vector<288x256xf32> to vector<32x256xf32>
    %c255_i32 = arith.constant 255 : i32
    %35 = tpu.dynamic_rotate %34 by %c255_i32 dim 1 : vector<32x256xf32>, i32 -> vector<32x256xf32>
    %36 = vector.extract_strided_slice %2 {offsets = [5, 0], sizes = [1, 256], strides = [1, 1]} : vector<9x256xf32> to vector<1x256xf32>
    %37 = vector.broadcast %36 : vector<1x256xf32> to vector<32x256xf32>
    %38 = arith.mulf %35, %37 : vector<32x256xf32>
    %39 = arith.addf %33, %38 : vector<32x256xf32>
    %40 = vector.extract_strided_slice %8 {offsets = [192, 0], sizes = [32, 256], strides = [1, 1]} : vector<288x256xf32> to vector<32x256xf32>
    %c241_i32 = arith.constant 241 : i32
    %41 = tpu.dynamic_rotate %40 by %c241_i32 dim 1 : vector<32x256xf32>, i32 -> vector<32x256xf32>
    %42 = vector.extract_strided_slice %2 {offsets = [6, 0], sizes = [1, 256], strides = [1, 1]} : vector<9x256xf32> to vector<1x256xf32>
    %43 = vector.broadcast %42 : vector<1x256xf32> to vector<32x256xf32>
    %44 = arith.mulf %41, %43 : vector<32x256xf32>
    %45 = arith.addf %39, %44 : vector<32x256xf32>
    %46 = vector.extract_strided_slice %8 {offsets = [224, 0], sizes = [32, 256], strides = [1, 1]} : vector<288x256xf32> to vector<32x256xf32>
    %c240_i32 = arith.constant 240 : i32
    %47 = tpu.dynamic_rotate %46 by %c240_i32 dim 1 : vector<32x256xf32>, i32 -> vector<32x256xf32>
    %48 = vector.extract_strided_slice %2 {offsets = [7, 0], sizes = [1, 256], strides = [1, 1]} : vector<9x256xf32> to vector<1x256xf32>
    %49 = vector.broadcast %48 : vector<1x256xf32> to vector<32x256xf32>
    %50 = arith.mulf %47, %49 : vector<32x256xf32>
    %51 = arith.addf %45, %50 : vector<32x256xf32>
    %52 = vector.extract_strided_slice %8 {offsets = [256, 0], sizes = [32, 256], strides = [1, 1]} : vector<288x256xf32> to vector<32x256xf32>
    %c239_i32 = arith.constant 239 : i32
    %53 = tpu.dynamic_rotate %52 by %c239_i32 dim 1 : vector<32x256xf32>, i32 -> vector<32x256xf32>
    %54 = vector.extract_strided_slice %2 {offsets = [8, 0], sizes = [1, 256], strides = [1, 1]} : vector<9x256xf32> to vector<1x256xf32>
    %55 = vector.broadcast %54 : vector<1x256xf32> to vector<32x256xf32>
    %56 = arith.mulf %53, %55 : vector<32x256xf32>
    %57 = arith.addf %51, %56 : vector<32x256xf32>
    %cst_9 = arith.constant 0.000000e+00 : f32
    %58 = vector.broadcast %cst_9 : f32 to vector<32x256xf32>
    %59 = arith.maximumf %57, %58 : vector<32x256xf32>
    %60 = arith.truncf %59 : vector<32x256xf32> to vector<32x256xbf16>
    %cst_10 = arith.constant dense<0.000000e+00> : vector<128x256xf32>
    %61 = tpu.matmul %1, %60, %cst_10 {dimension_numbers = #tpu.dot_dimension_numbers<[1], [0], [0], [1], [0, 0, 1, 1], [], []>} : vector<128x32xbf16>, vector<32x256xbf16>, vector<128x256xf32> -> vector<128x256xf32>
    %62 = arith.addf %4, %61 : vector<128x256xf32>
    %c0_11 = arith.constant 0 : index
    %c0_12 = arith.constant 0 : index
    %c0_13 = arith.constant 0 : index
    %63 = vector.load %arg5[%c0_11, %c0_12, %c0_13] : memref<2x128x256xf32, #tpu.memory_space<vmem>>, vector<1x128x256xf32>
    %64 = vector.shape_cast %63 : vector<1x128x256xf32> to vector<128x256xf32>
    %65 = vector.shape_cast %62 : vector<128x256xf32> to vector<1x128x256xf32>
    tpu.vector_store %arg5[%c0_11, %c0_12, %c0_13], %65 {strides = array<i32>} : memref<2x128x256xf32, #tpu.memory_space<vmem>>, vector<1x128x256xf32>,
    %c1 = arith.constant 1 : index
    %c0_14 = arith.constant 0 : index
    %c0_15 = arith.constant 0 : index
    %66 = vector.load %arg1[%c1, %c0_14, %c0_15] : memref<2x128x256xf32, #tpu.memory_space<vmem>>, vector<1x128x256xf32>
    %67 = vector.shape_cast %66 : vector<1x128x256xf32> to vector<128x256xf32>
    %cst_16 = arith.constant 0.000000e+00 : f32
    %68 = vector.broadcast %cst_16 : f32 to vector<128x256xf32>
    %69 = arith.maximumf %67, %68 : vector<128x256xf32>
    %70 = arith.truncf %69 : vector<128x256xf32> to vector<128x256xbf16>
    %cst_17 = arith.constant dense<0.000000e+00> : vector<288x256xf32>
    %71 = tpu.matmul %0, %70, %cst_17 {dimension_numbers = #tpu.dot_dimension_numbers<[1], [0], [0], [1], [0, 0, 1, 1], [], []>} : vector<288x128xbf16>, vector<128x256xbf16>, vector<288x256xf32> -> vector<288x256xf32>
    %72 = vector.extract_strided_slice %71 {offsets = [128, 0], sizes = [32, 256], strides = [1, 1]} : vector<288x256xf32> to vector<32x256xf32>
    %73 = vector.extract_strided_slice %71 {offsets = [0, 0], sizes = [32, 256], strides = [1, 1]} : vector<288x256xf32> to vector<32x256xf32>
    %c17_i32_18 = arith.constant 17 : i32
    %74 = tpu.dynamic_rotate %73 by %c17_i32_18 dim 1 : vector<32x256xf32>, i32 -> vector<32x256xf32>
    %75 = vector.extract_strided_slice %2 {offsets = [0, 0], sizes = [1, 256], strides = [1, 1]} : vector<9x256xf32> to vector<1x256xf32>
    %76 = vector.broadcast %75 : vector<1x256xf32> to vector<32x256xf32>
    %77 = arith.mulf %74, %76 : vector<32x256xf32>
    %78 = arith.addf %72, %77 : vector<32x256xf32>
    %79 = vector.extract_strided_slice %71 {offsets = [32, 0], sizes = [32, 256], strides = [1, 1]} : vector<288x256xf32> to vector<32x256xf32>
    %c16_i32_19 = arith.constant 16 : i32
    %80 = tpu.dynamic_rotate %79 by %c16_i32_19 dim 1 : vector<32x256xf32>, i32 -> vector<32x256xf32>
    %81 = vector.extract_strided_slice %2 {offsets = [1, 0], sizes = [1, 256], strides = [1, 1]} : vector<9x256xf32> to vector<1x256xf32>
    %82 = vector.broadcast %81 : vector<1x256xf32> to vector<32x256xf32>
    %83 = arith.mulf %80, %82 : vector<32x256xf32>
    %84 = arith.addf %78, %83 : vector<32x256xf32>
    %85 = vector.extract_strided_slice %71 {offsets = [64, 0], sizes = [32, 256], strides = [1, 1]} : vector<288x256xf32> to vector<32x256xf32>
    %c15_i32_20 = arith.constant 15 : i32
    %86 = tpu.dynamic_rotate %85 by %c15_i32_20 dim 1 : vector<32x256xf32>, i32 -> vector<32x256xf32>
    %87 = vector.extract_strided_slice %2 {offsets = [2, 0], sizes = [1, 256], strides = [1, 1]} : vector<9x256xf32> to vector<1x256xf32>
    %88 = vector.broadcast %87 : vector<1x256xf32> to vector<32x256xf32>
    %89 = arith.mulf %86, %88 : vector<32x256xf32>
    %90 = arith.addf %84, %89 : vector<32x256xf32>
    %91 = vector.extract_strided_slice %71 {offsets = [96, 0], sizes = [32, 256], strides = [1, 1]} : vector<288x256xf32> to vector<32x256xf32>
    %c1_i32_21 = arith.constant 1 : i32
    %92 = tpu.dynamic_rotate %91 by %c1_i32_21 dim 1 : vector<32x256xf32>, i32 -> vector<32x256xf32>
    %93 = vector.extract_strided_slice %2 {offsets = [3, 0], sizes = [1, 256], strides = [1, 1]} : vector<9x256xf32> to vector<1x256xf32>
    %94 = vector.broadcast %93 : vector<1x256xf32> to vector<32x256xf32>
    %95 = arith.mulf %92, %94 : vector<32x256xf32>
    %96 = arith.addf %90, %95 : vector<32x256xf32>
    %97 = vector.extract_strided_slice %71 {offsets = [160, 0], sizes = [32, 256], strides = [1, 1]} : vector<288x256xf32> to vector<32x256xf32>
    %c255_i32_22 = arith.constant 255 : i32
    %98 = tpu.dynamic_rotate %97 by %c255_i32_22 dim 1 : vector<32x256xf32>, i32 -> vector<32x256xf32>
    %99 = vector.extract_strided_slice %2 {offsets = [5, 0], sizes = [1, 256], strides = [1, 1]} : vector<9x256xf32> to vector<1x256xf32>
    %100 = vector.broadcast %99 : vector<1x256xf32> to vector<32x256xf32>
    %101 = arith.mulf %98, %100 : vector<32x256xf32>
    %102 = arith.addf %96, %101 : vector<32x256xf32>
    %103 = vector.extract_strided_slice %71 {offsets = [192, 0], sizes = [32, 256], strides = [1, 1]} : vector<288x256xf32> to vector<32x256xf32>
    %c241_i32_23 = arith.constant 241 : i32
    %104 = tpu.dynamic_rotate %103 by %c241_i32_23 dim 1 : vector<32x256xf32>, i32 -> vector<32x256xf32>
    %105 = vector.extract_strided_slice %2 {offsets = [6, 0], sizes = [1, 256], strides = [1, 1]} : vector<9x256xf32> to vector<1x256xf32>
    %106 = vector.broadcast %105 : vector<1x256xf32> to vector<32x256xf32>
    %107 = arith.mulf %104, %106 : vector<32x256xf32>
    %108 = arith.addf %102, %107 : vector<32x256xf32>
    %109 = vector.extract_strided_slice %71 {offsets = [224, 0], sizes = [32, 256], strides = [1, 1]} : vector<288x256xf32> to vector<32x256xf32>
    %c240_i32_24 = arith.constant 240 : i32
    %110 = tpu.dynamic_rotate %109 by %c240_i32_24 dim 1 : vector<32x256xf32>, i32 -> vector<32x256xf32>
    %111 = vector.extract_strided_slice %2 {offsets = [7, 0], sizes = [1, 256], strides = [1, 1]} : vector<9x256xf32> to vector<1x256xf32>
    %112 = vector.broadcast %111 : vector<1x256xf32> to vector<32x256xf32>
    %113 = arith.mulf %110, %112 : vector<32x256xf32>
    %114 = arith.addf %108, %113 : vector<32x256xf32>
    %115 = vector.extract_strided_slice %71 {offsets = [256, 0], sizes = [32, 256], strides = [1, 1]} : vector<288x256xf32> to vector<32x256xf32>
    %c239_i32_25 = arith.constant 239 : i32
    %116 = tpu.dynamic_rotate %115 by %c239_i32_25 dim 1 : vector<32x256xf32>, i32 -> vector<32x256xf32>
    %117 = vector.extract_strided_slice %2 {offsets = [8, 0], sizes = [1, 256], strides = [1, 1]} : vector<9x256xf32> to vector<1x256xf32>
    %118 = vector.broadcast %117 : vector<1x256xf32> to vector<32x256xf32>
    %119 = arith.mulf %116, %118 : vector<32x256xf32>
    %120 = arith.addf %114, %119 : vector<32x256xf32>
    %cst_26 = arith.constant 0.000000e+00 : f32
    %121 = vector.broadcast %cst_26 : f32 to vector<32x256xf32>
    %122 = arith.maximumf %120, %121 : vector<32x256xf32>
    %123 = arith.truncf %122 : vector<32x256xf32> to vector<32x256xbf16>
    %cst_27 = arith.constant dense<0.000000e+00> : vector<128x256xf32>
    %124 = tpu.matmul %1, %123, %cst_27 {dimension_numbers = #tpu.dot_dimension_numbers<[1], [0], [0], [1], [0, 0, 1, 1], [], []>} : vector<128x32xbf16>, vector<32x256xbf16>, vector<128x256xf32> -> vector<128x256xf32>
    %125 = arith.addf %67, %124 : vector<128x256xf32>
    %c1_28 = arith.constant 1 : index
    %c0_29 = arith.constant 0 : index
    %c0_30 = arith.constant 0 : index
    %126 = vector.load %arg5[%c1_28, %c0_29, %c0_30] : memref<2x128x256xf32, #tpu.memory_space<vmem>>, vector<1x128x256xf32>
    %127 = vector.shape_cast %126 : vector<1x128x256xf32> to vector<128x256xf32>
    %128 = vector.shape_cast %125 : vector<128x256xf32> to vector<1x128x256xf32>
    tpu.vector_store %arg5[%c1_28, %c0_29, %c0_30], %128 {strides = array<i32>} : memref<2x128x256xf32, #tpu.memory_space<vmem>>, vector<1x128x256xf32>,
    return
  }
  func.func @transform_0(%arg0: i32) -> (i32, i32, i32) {
    %c0_i32 = arith.constant 0 : i32
    %c0_i32_0 = arith.constant 0 : i32
    %c0_i32_1 = arith.constant 0 : i32
    return %arg0, %c0_i32, %c0_i32_0 : i32, i32, i32
  }
  func.func @transform_1(%arg0: i32) -> (i32, i32) {
    %c0_i32 = arith.constant 0 : i32
    %c0_i32_0 = arith.constant 0 : i32
    %c0_i32_1 = arith.constant 0 : i32
    return %c0_i32, %c0_i32_0 : i32, i32
  }
  func.func @transform_2(%arg0: i32) -> (i32, i32) {
    %c0_i32 = arith.constant 0 : i32
    %c0_i32_0 = arith.constant 0 : i32
    %c0_i32_1 = arith.constant 0 : i32
    return %c0_i32, %c0_i32_0 : i32, i32
  }
  func.func @transform_3(%arg0: i32) -> (i32, i32) {
    %c0_i32 = arith.constant 0 : i32
    %c0_i32_0 = arith.constant 0 : i32
    %c0_i32_1 = arith.constant 0 : i32
    return %c0_i32, %c0_i32_0 : i32, i32
  }
  func.func @transform_4(%arg0: i32) -> (i32, i32, i32) {
    %c0_i32 = arith.constant 0 : i32
    %c0_i32_0 = arith.constant 0 : i32
    %c0_i32_1 = arith.constant 0 : i32
    return %arg0, %c0_i32, %c0_i32_0 : i32, i32, i32
  }
}

</mosaic_0001>

<bundles_post_ra>
// kernel: residual_forward.1
= control target key start
LH: loop header
LB: loop body
LE: loop exit
PB: predicated region body
PF: predicated region fallthrough
CT: control target
= control target key end

     0   :  { %s2478_s15 = smov 0   ;;  %s3768_s0 = inlined_call_operand.vmem [shape: f32[8,128,256], index: 0, kind: input, shape index: {}]   ;;  %s3769_s1 = inlined_call_operand.vmem [shape: bf16[288,128], index: 1, kind: input, shape index: {}]   ;;  %s3770_s2 = inlined_call_operand.vmem [shape: bf16[128,32], index: 2, kind: input, shape index: {}]   ;;  %s3771_s3 = inlined_call_operand.vmem [shape: f32[9,256], index: 3, kind: input, shape index: {}]   ;;  %s3772_s4 = inlined_call_operand.vmem [shape: f32[8,128,256], index: 4, kind: output, shape index: {}]  }
   0x1 LB: > { %s2174_s16 = sadd.s32 4294967295, %s2442_s15   ;;  %p2178_p0 = scmp.ge.s32.totalorder %s2442_s15, 1  ;;  %s2442_s15 = sphi %s2478_s15, %s14_s15  }
   0x2   : > { %p164_p1 = scmp.lt.s32.totalorder %s2442_s15, 5 }
   0x4   : > { %p165_p2 = pnand %p2178_p0, %p164_p1 }
   0x6   : > { %168 = sbr.rel (%p165_p2) target bundleno = 1350 (0x546), region = 36 }
   0xd   : > { %s2179_s17 = sshll.u32 %s2174_s16, 1  ;;  %v3773_v0 = vmov 0   ;;  %s2445_s10 = smov 17   ;;  %vm1110_vm8 = vcmask 261120  }
   0xe   : > { %p193_p3 = scmp.lt.s32.totalorder %s2179_s17, 7  ;;  %483 = vmatprep.mubr.bf16.mxu0 %v3773_v0  ;;  %1167 = vmatprep.mubr.bf16.mxu1 %v3773_v0  ;;  %s2446_s11 = smov 16  }
   0xf   : > { %s2447_s12 = smov 15   ;;  %s2448_s13 = smov 1  }
  0x10   : > { %s3812_s17 = smov (!%p193_p3, %s2179_s17), 7  ;;  %s2449_s14 = smov 127  }
  0x11   : > { %s2295_s18 = sshll.u32 %s3812_s17, 8  ;;  %s2450_s16 = smov 113  }
  0x12   : > { %s2496_s21 = scalar_lea.vmem %s3768_s0, %s2295_s18  ;;  %s2451_s19 = smov 112  }
  0x13   : > { %v264_v1 = vld [vmem:[%s2496_s21 + $0x8] sm:$0xff]  ;;  %v266_v2 = vld [vmem:[%s2496_s21 + $0x18] sm:$0xff]  ;;  %v263_v3 = vld [vmem:[%s2496_s21] sm:$0xff]  ;;  %s2452_s20 = smov 111   ;;  %s3275_s28 = scalar_lea.vmem %s3772_s4, %s2295_s18 }
  0x14   : > { %v296_v4 = vmax.f32 %v264_v1, 0.0  ;;  %v298_v5 = vmax.f32 %v266_v2, 0.0  ;;  %v265_v6 = vld [vmem:[%s2496_s21 + $0x10] sm:$0xff]  ;;  %v295_v7 = vmax.f32 %v263_v3, 0.0  ;;  %v268_v8 = vld [vmem:[%s2496_s21 + $0x28] sm:$0xff]  ;;  %v270_v9 = vld [vmem:[%s2496_s21 + $0x38] sm:$0xff] }
  0x15   : > { %v297_v10 = vmax.f32 %v265_v6, 0.0  ;;  %v300_v11 = vmax.f32 %v268_v8, 0.0  ;;  %v302_v12 = vmax.f32 %v270_v9, 0.0  ;;  %v267_v13 = vld [vmem:[%s2496_s21 + $0x20] sm:$0xff]  ;;  %v269_v14 = vld [vmem:[%s2496_s21 + $0x30] sm:$0xff]  ;;  %v272_v15 = vld [vmem:[%s2496_s21 + $0x48] sm:$0xff] }
  0x16   : > { %v328_v16 = vpack.c.bf16 %v298_v5, %v296_v4  ;;  %v299_v17 = vmax.f32 %v267_v13, 0.0  ;;  %v301_v18 = vmax.f32 %v269_v14, 0.0  ;;  %v274_v19 = vld [vmem:[%s2496_s21 + $0x58] sm:$0xff]  ;;  %v304_v20 = vmax.f32 %v272_v15, 0.0  ;;  %v271_v21 = vld [vmem:[%s2496_s21 + $0x40] sm:$0xff]  ;;  %v273_v22 = vld [vmem:[%s2496_s21 + $0x50] sm:$0xff] }
  0x17   : > { %v327_v23 = vpack.c.bf16 %v297_v10, %v295_v7  ;;  %v330_v24 = vpack.c.bf16 %v302_v12, %v300_v11  ;;  %v306_v25 = vmax.f32 %v274_v19, 0.0  ;;  %v276_v26 = vld [vmem:[%s2496_s21 + $0x68] sm:$0xff]  ;;  %v278_v27 = vld [vmem:[%s2496_s21 + $0x78] sm:$0xff]  ;;  %v303_v29 = vmax.f32 %v271_v21, 0.0  ;;  %v275_v31 = vld [vmem:[%s2496_s21 + $0x60] sm:$0xff] }
  0x18   : > { %451 = vmatprep.subr.bf16.mxu0 %v328_v16  ;;  %v329_v28 = vpack.c.bf16 %v301_v18, %v299_v17  ;;  %v305_v30 = vmax.f32 %v273_v22, 0.0  ;;  %v277_v32 = vld [vmem:[%s2496_s21 + $0x70] sm:$0xff]  ;;  %v308_v34 = vmax.f32 %v276_v26, 0.0  ;;  %v310_v35 = vmax.f32 %v278_v27, 0.0  ;;  %v280_v36 = vld [vmem:[%s2496_s21 + $0x88] sm:$0xff]  ;;  %v282_v37 = vld [vmem:[%s2496_s21 + $0x98] sm:$0xff] }
  0x19   : > { %452 = vmatpush1.bf16.msra.mxu0 %v327_v23  ;;  %v332_v33 = vpack.c.bf16 %v306_v25, %v304_v20  ;;  %v279_v38 = vld [vmem:[%s2496_s21 + $0x80] sm:$0xff]  ;;  %v281_v39 = vld [vmem:[%s2496_s21 + $0x90] sm:$0xff]  ;;  %v284_v40 = vld [vmem:[%s2496_s21 + $0xa8] sm:$0xff]  ;;  %v307_v41 = vmax.f32 %v275_v31, 0.0  ;;  %v309_v42 = vmax.f32 %v277_v32, 0.0  ;;  %v312_v45 = vmax.f32 %v280_v36, 0.0 }
  0x1a   : > { %453 = vmatprep.subr.bf16.mxu0 %v330_v24  ;;  %v286_v43 = vld [vmem:[%s2496_s21 + $0xb8] sm:$0xff]  ;;  %v331_v44 = vpack.c.bf16 %v305_v30, %v303_v29  ;;  %v314_v46 = vmax.f32 %v282_v37, 0.0  ;;  %v311_v47 = vmax.f32 %v279_v38, 0.0  ;;  %v283_v48 = vld [vmem:[%s2496_s21 + $0xa0] sm:$0xff]  ;;  %v334_v49 = vpack.c.bf16 %v310_v35, %v308_v34  ;;  %v285_v52 = vld [vmem:[%s2496_s21 + $0xb0] sm:$0xff] }
  0x1b   : > { %v313_v50 = vmax.f32 %v281_v39, 0.0  ;;  %v316_v51 = vmax.f32 %v284_v40, 0.0  ;;  %v288_v53 = vld [vmem:[%s2496_s21 + $0xc8] sm:$0xff]  ;;  %v318_v54 = vmax.f32 %v286_v43, 0.0  ;;  %v290_v55 = vld [vmem:[%s2496_s21 + $0xd8] sm:$0xff]  ;;  %v315_v56 = vmax.f32 %v283_v48, 0.0 }
  0x1c   : > { %v287_v57 = vld [vmem:[%s2496_s21 + $0xc0] sm:$0xff]  ;;  %v333_v58 = vpack.c.bf16 %v309_v42, %v307_v41  ;;  %v317_v59 = vmax.f32 %v285_v52, 0.0  ;;  %v289_v60 = vld [vmem:[%s2496_s21 + $0xd0] sm:$0xff]  ;;  %v336_v61 = vpack.c.bf16 %v314_v46, %v312_v45  ;;  %v320_v62 = vmax.f32 %v288_v53, 0.0  ;;  %v292_v63 = vld [vmem:[%s2496_s21 + $0xe8] sm:$0xff] }
  0x1d   : > { %454 = vmatpush1.bf16.msra.mxu0 %v329_v28  ;;  %v322_v1 = vmax.f32 %v290_v55, 0.0  ;;  %v294_v2 = vld [vmem:[%s2496_s21 + $0xf8] sm:$0xff]  ;;  %v319_v3 = vmax.f32 %v287_v57, 0.0  ;;  %v291_v4 = vld [vmem:[%s2496_s21 + $0xe0] sm:$0xff]  ;;  %v335_v5 = vpack.c.bf16 %v313_v50, %v311_v47  ;;  %v321_v6 = vmax.f32 %v289_v60, 0.0  ;;  %v293_v7 = vld [vmem:[%s2496_s21 + $0xf0] sm:$0xff] }
  0x1e   : > { %455 = vmatprep.subr.bf16.mxu0 %v332_v33  ;;  %v338_v8 = vpack.c.bf16 %v318_v54, %v316_v51  ;;  %v324_v9 = vmax.f32 %v292_v63, 0.0  ;;  %v326_v10 = vmax.f32 %v294_v2, 0.0  ;;  %v337_v11 = vpack.c.bf16 %v317_v59, %v315_v56  ;;  %v2318_v18 = vld [vmem:[%s3769_s1] sm:$0xff]   ;;  %v2319_v19 = vld [vmem:[%s3769_s1 + $0x8] sm:$0xff]   ;;  %v2320_v20 = vld [vmem:[%s3769_s1 + $0x10] sm:$0xff]  }
  0x1f   : > { %v323_v12 = vmax.f32 %v291_v4, 0.0  ;;  %v325_v13 = vmax.f32 %v293_v7, 0.0  ;;  %v340_v14 = vpack.c.bf16 %v322_v1, %v320_v62  ;;  %v339_v15 = vpack.c.bf16 %v321_v6, %v319_v3  ;;  %v2321_v21 = vld [vmem:[%s3769_s1 + $0x18] sm:$0xff]   ;;  %v2322_v22 = vld [vmem:[%s3769_s1 + $0x20] sm:$0xff]   ;;  %v2323_v23 = vld [vmem:[%s3769_s1 + $0x28] sm:$0xff]  }
  0x20   : > { %v342_v16 = vpack.c.bf16 %v326_v10, %v324_v9  ;;  %v2324_v24 = vld [vmem:[%s3769_s1 + $0x30] sm:$0xff]   ;;  %v2325_v25 = vld [vmem:[%s3769_s1 + $0x38] sm:$0xff]   ;;  %v2326_v26 = vld [vmem:[%s3769_s1 + $0x40] sm:$0xff]  }
  0x21   : > { %456 = vmatpush1.bf16.msra.mxu0 %v331_v44  ;;  %v341_v17 = vpack.c.bf16 %v325_v13, %v323_v12  ;;  %v2327_v27 = vld [vmem:[%s3769_s1 + $0x48] sm:$0xff]   ;;  %v2328_v28 = vld [vmem:[%s3769_s1 + $0x50] sm:$0xff]   ;;  %v2329_v29 = vld [vmem:[%s3769_s1 + $0x58] sm:$0xff]  }
  0x22   : > { %457 = vmatprep.subr.bf16.mxu0 %v334_v49  ;;  %v2330_v30 = vld [vmem:[%s3769_s1 + $0x60] sm:$0xff]   ;;  %v2331_v31 = vld [vmem:[%s3769_s1 + $0x68] sm:$0xff]   ;;  %v2332_v32 = vld [vmem:[%s3769_s1 + $0x70] sm:$0xff]  }
  0x23   : > { %v2333_v33 = vld [vmem:[%s3769_s1 + $0x78] sm:$0xff]   ;;  %v2334_v34 = vld [vmem:[%s3769_s1 + $0x80] sm:$0xff]   ;;  %v2335_v35 = vld [vmem:[%s3769_s1 + $0x88] sm:$0xff]  }
  0x25   : > { %458 = vmatpush1.bf16.msra.mxu0 %v333_v58 }
  0x26   : > { %459 = vmatprep.subr.bf16.mxu0 %v336_v61 }
  0x29   : > { %460 = vmatpush1.bf16.msra.mxu0 %v335_v5 }
  0x2a   : > { %461 = vmatprep.subr.bf16.mxu0 %v338_v8 }
  0x2d   : > { %462 = vmatpush1.bf16.msra.mxu0 %v337_v11 }
  0x2e   : > { %463 = vmatprep.subr.bf16.mxu0 %v340_v14 }
  0x31   : > { %464 = vmatpush1.bf16.msra.mxu0 %v339_v15 }
  0x32   : > { %465 = vmatprep.subr.bf16.mxu0 %v342_v16 }
  0x35   : > { %466 = vmatpush1.bf16.msra.mxu0 %v341_v17 }
  0x38   : > { %484 = vmatmul.mubr.bf16.vlgmr.msra.gmra.mrb[0].mxu0 %v2318_v18 }
  0x39   : > { %493 = vmatprep.mubr.bf16.mxu0 %v3773_v0 }
  0x40   : > { %494 = vmatmul.mubr.bf16.gmra.mrb[4].mxu0 %v2319_v19 }
  0x41   : > { %503 = vmatprep.mubr.bf16.mxu0 %v3773_v0 }
  0x48   : > { %504 = vmatmul.mubr.bf16.gmra.mrb[8].mxu0 %v2320_v20 }
  0x49   : > { %513 = vmatprep.mubr.bf16.mxu0 %v3773_v0 }
  0x50   : > { %514 = vmatmul.mubr.bf16.gmra.mrb[12].mxu0 %v2321_v21 }
  0x51   : > { %523 = vmatprep.mubr.bf16.mxu0 %v3773_v0 }
  0x58   : > { %524 = vmatmul.mubr.bf16.gmra.mrb[16].mxu0 %v2322_v22 }
  0x59   : > { %533 = vmatprep.mubr.bf16.mxu0 %v3773_v0 }
  0x60   : > { %534 = vmatmul.mubr.bf16.gmra.mrb[20].mxu0 %v2323_v23 }
  0x61   : > { %543 = vmatprep.mubr.bf16.mxu0 %v3773_v0 }
  0x68   : > { %544 = vmatmul.mubr.bf16.gmra.mrb[24].mxu0 %v2324_v24 }
  0x69   : > { %553 = vmatprep.mubr.bf16.mxu0 %v3773_v0 }
  0x70   : > { %554 = vmatmul.mubr.bf16.gmra.mrb[28].mxu0 %v2325_v25 }
  0x71   : > { %563 = vmatprep.mubr.bf16.mxu0 %v3773_v0 }
  0x78   : > { %564 = vmatmul.mubr.bf16.gmra.mrb[32].mxu0 %v2326_v26 }
  0x79   : > { %573 = vmatprep.mubr.bf16.mxu0 %v3773_v0 }
  0x80   : > { %574 = vmatmul.mubr.bf16.gmra.mrb[36].mxu0 %v2327_v27 }
  0x81   : > { %583 = vmatprep.mubr.bf16.mxu0 %v3773_v0 }
  0x88   : > { %584 = vmatmul.mubr.bf16.gmra.mrb[40].mxu0 %v2328_v28 }
  0x89   : > { %593 = vmatprep.mubr.bf16.mxu0 %v3773_v0 }
  0x90   : > { %594 = vmatmul.mubr.bf16.gmra.mrb[44].mxu0 %v2329_v29 }
  0x91   : > { %603 = vmatprep.mubr.bf16.mxu0 %v3773_v0 }
  0x98   : > { %604 = vmatmul.mubr.bf16.gmra.mrb[48].mxu0 %v2330_v30 }
  0x99   : > { %613 = vmatprep.mubr.bf16.mxu0 %v3773_v0 }
  0xa0   : > { %614 = vmatmul.mubr.bf16.gmra.mrb[52].mxu0 %v2331_v31 }
  0xa1   : > { %623 = vmatprep.mubr.bf16.mxu0 %v3773_v0 }
  0xa8   : > { %624 = vmatmul.mubr.bf16.gmra.mrb[56].mxu0 %v2332_v32 }
  0xa9   : > { %633 = vmatprep.mubr.bf16.mxu0 %v3773_v0 }
  0xb0   : > { %634 = vmatmul.mubr.bf16.gmra.mrb[60].mxu0 %v2333_v33 }
  0xb1   : > { %643 = vmatprep.mubr.bf16.mxu0 %v3773_v0 }
  0xb8   : > { %644 = vmatmul.mubr.bf16.gmra.mrb[64].mxu0 %v2334_v34 }
  0xb9   : > { %653 = vmatprep.mubr.bf16.mxu0 %v3773_v0 }
  0xc0   : > { %654 = vmatmul.mubr.bf16.gmra.mrb[68].mxu0 %v2335_v35 }
  0xc1   : > { %1970 = vmatprep.mubr.bf16.mxu0 %v3773_v0 }
 0x10b   : > { %v485_v36 = vpop.f32.mrb[0].mxu0 }
 0x10c   : > { %664 = vrot.lane.b32.xlu0 %v485_v36, %s2445_s10  ;;  %v487_v37 = vpop.f32.mrb[1].mxu0 }
 0x10d   : > { %672 = vrot.lane.b32.xlu1 %v487_v37, %s2445_s10  ;;  %v489_v38 = vpop.f32.mrb[2].mxu0 }
 0x10e   : > { %v491_v39 = vpop.f32.mrb[3].mxu0 }
 0x110   : > { %666 = vrot.lane.b32.xlu0 %v489_v38, %s2445_s10 }
 0x111   : > { %674 = vrot.lane.b32.xlu1 %v491_v39, %s2445_s10 }
 0x113   : > { %v495_v40 = vpop.f32.mrb[4].mxu0 }
 0x114   : > { %668 = vrot.lane.b32.xlu0 %v495_v40, %s2445_s10  ;;  %v497_v41 = vpop.f32.mrb[5].mxu0 }
 0x115   : > { %v499_v42 = vpop.f32.mrb[6].mxu0 }
 0x116   : > { %670 = vrot.lane.b32.xlu1 %v499_v42, %s2445_s10  ;;  %v501_v43 = vpop.f32.mrb[7].mxu0 }
 0x118   : > { %676 = vrot.lane.b32.xlu0 %v497_v41, %s2445_s10 }
 0x11a   : > { %678 = vrot.lane.b32.xlu1 %v501_v43, %s2445_s10 }
 0x11b   : > { %v505_v44 = vpop.f32.mrb[8].mxu0 }
 0x11c   : > { %715 = vrot.lane.b32.xlu0 %v505_v44, %s2446_s11  ;;  %v507_v45 = vpop.f32.mrb[9].mxu0 }
 0x11d   : > { %v509_v46 = vpop.f32.mrb[10].mxu0 }
 0x11e   : > { %717 = vrot.lane.b32.xlu1 %v509_v46, %s2446_s11  ;;  %v511_v47 = vpop.f32.mrb[11].mxu0 }
 0x120   : > { %723 = vrot.lane.b32.xlu0 %v507_v45, %s2446_s11 }
 0x122   : > { %725 = vrot.lane.b32.xlu1 %v511_v47, %s2446_s11 }
 0x123   : > { %v515_v48 = vpop.f32.mrb[12].mxu0 }
 0x124   : > { %719 = vrot.lane.b32.xlu0 %v515_v48, %s2446_s11  ;;  %v517_v49 = vpop.f32.mrb[13].mxu0 }
 0x125   : > { %v519_v50 = vpop.f32.mrb[14].mxu0 }
 0x126   : > { %721 = vrot.lane.b32.xlu1 %v519_v50, %s2446_s11  ;;  %v521_v51 = vpop.f32.mrb[15].mxu0 }
 0x128   : > { %727 = vrot.lane.b32.xlu0 %v517_v49, %s2446_s11 }
 0x12a   : > { %729 = vrot.lane.b32.xlu1 %v521_v51, %s2446_s11 }
 0x12b   : > { %v525_v52 = vpop.f32.mrb[16].mxu0 }
 0x12c   : > { %764 = vrot.lane.b32.xlu0 %v525_v52, %s2447_s12  ;;  %v527_v53 = vpop.f32.mrb[17].mxu0 }
 0x12d   : > { %v529_v54 = vpop.f32.mrb[18].mxu0 }
 0x12e   : > { %766 = vrot.lane.b32.xlu1 %v529_v54, %s2447_s12  ;;  %v531_v55 = vpop.f32.mrb[19].mxu0 }
 0x130   : > { %772 = vrot.lane.b32.xlu0 %v527_v53, %s2447_s12 }
 0x132   : > { %774 = vrot.lane.b32.xlu1 %v531_v55, %s2447_s12 }
 0x133   : > { %v535_v56 = vpop.f32.mrb[20].mxu0 }
 0x134   : > { %768 = vrot.lane.b32.xlu0 %v535_v56, %s2447_s12  ;;  %v537_v57 = vpop.f32.mrb[21].mxu0 }
 0x135   : > { %v539_v58 = vpop.f32.mrb[22].mxu0 }
 0x136   : > { %770 = vrot.lane.b32.xlu1 %v539_v58, %s2447_s12  ;;  %v541_v59 = vpop.f32.mrb[23].mxu0 }
 0x138   : > { %776 = vrot.lane.b32.xlu0 %v537_v57, %s2447_s12 }
 0x13a   : > { %778 = vrot.lane.b32.xlu1 %v541_v59, %s2447_s12 }
 0x13b   : > { %v545_v60 = vpop.f32.mrb[24].mxu0 }
 0x13c   : > { %813 = vrot.lane.b32.xlu0 %v545_v60, %s2448_s13  ;;  %v547_v61 = vpop.f32.mrb[25].mxu0 }
 0x13d   : > { %v549_v62 = vpop.f32.mrb[26].mxu0 }
 0x13e   : > { %815 = vrot.lane.b32.xlu1 %v549_v62, %s2448_s13  ;;  %v551_v63 = vpop.f32.mrb[27].mxu0 }
 0x140   : > { %821 = vrot.lane.b32.xlu0 %v547_v61, %s2448_s13 }
 0x142   : > { %823 = vrot.lane.b32.xlu1 %v551_v63, %s2448_s13 }
 0x143   : > { %v555_v1 = vpop.f32.mrb[28].mxu0 }
 0x144   : > { %817 = vrot.lane.b32.xlu0 %v555_v1, %s2448_s13  ;;  %v557_v2 = vpop.f32.mrb[29].mxu0 }
 0x145   : > { %v559_v3 = vpop.f32.mrb[30].mxu0 }
 0x146   : > { %819 = vrot.lane.b32.xlu1 %v559_v3, %s2448_s13  ;;  %v561_v4 = vpop.f32.mrb[31].mxu0 }
 0x148   : > { %825 = vrot.lane.b32.xlu0 %v557_v2, %s2448_s13 }
 0x14a   : > { %827 = vrot.lane.b32.xlu1 %v561_v4, %s2448_s13 }
 0x14b   : > { %v2634_v5 = vpop.f32.mrb[32].mxu0 }
 0x14c   : > { %v2636_v6 = vpop.f32.mrb[33].mxu0 }
 0x14d   : > { %v2638_v7 = vpop.f32.mrb[34].mxu0 }
 0x14e   : > { %v2640_v8 = vpop.f32.mrb[35].mxu0 }
 0x153   : > { %v2642_v9 = vpop.f32.mrb[36].mxu0 }
 0x154   : > { %v2644_v10 = vpop.f32.mrb[37].mxu0 }
 0x155   : > { %v2646_v11 = vpop.f32.mrb[38].mxu0 }
 0x156   : > { %v2648_v12 = vpop.f32.mrb[39].mxu0 }
 0x15b   : > { %v585_v13 = vpop.f32.mrb[40].mxu0 }
 0x15c   : > { %862 = vrot.lane.b32.xlu0 %v585_v13, %s2449_s14  ;;  %v587_v14 = vpop.f32.mrb[41].mxu0 }
 0x15d   : > { %v589_v15 = vpop.f32.mrb[42].mxu0 }
 0x15e   : > { %864 = vrot.lane.b32.xlu1 %v589_v15, %s2449_s14  ;;  %v591_v16 = vpop.f32.mrb[43].mxu0 }
 0x160   : > { %870 = vrot.lane.b32.xlu0 %v587_v14, %s2449_s14 }
 0x162   : > { %872 = vrot.lane.b32.xlu1 %v591_v16, %s2449_s14 }
 0x163   : > { %v595_v17 = vpop.f32.mrb[44].mxu0 }
 0x164   : > { %866 = vrot.lane.b32.xlu0 %v595_v17, %s2449_s14  ;;  %v597_v18 = vpop.f32.mrb[45].mxu0 }
 0x165   : > { %v599_v19 = vpop.f32.mrb[46].mxu0 }
 0x166   : > { %868 = vrot.lane.b32.xlu1 %v599_v19, %s2449_s14  ;;  %v601_v20 = vpop.f32.mrb[47].mxu0 }
 0x168   : > { %874 = vrot.lane.b32.xlu0 %v597_v18, %s2449_s14 }
 0x16a   : > { %876 = vrot.lane.b32.xlu1 %v601_v20, %s2449_s14 }
 0x16b   : > { %v605_v21 = vpop.f32.mrb[48].mxu0 }
 0x16c   : > { %911 = vrot.lane.b32.xlu0 %v605_v21, %s2450_s16  ;;  %v607_v22 = vpop.f32.mrb[49].mxu0  ;;  %v680_v21 = vlaneseq }
 0x16d   : > { %v609_v23 = vpop.f32.mrb[50].mxu0 }
 0x16e   : > { %913 = vrot.lane.b32.xlu1 %v609_v23, %s2450_s16  ;;  %v611_v24 = vpop.f32.mrb[51].mxu0 }
 0x170   : > { %919 = vrot.lane.b32.xlu0 %v607_v22, %s2450_s16 }
 0x172   : > { %921 = vrot.lane.b32.xlu1 %v611_v24, %s2450_s16  ;;  %v692_v24 = vshrl.u32 %v680_v21, 7 }
 0x173   : > { %v615_v25 = vpop.f32.mrb[52].mxu0 }
 0x174   : > { %915 = vrot.lane.b32.xlu0 %v615_v25, %s2450_s16  ;;  %v617_v26 = vpop.f32.mrb[53].mxu0  ;;  %v938_v0 = vsub.s32 6, %v692_v24 }
 0x175   : > { %v619_v27 = vpop.f32.mrb[54].mxu0 }
 0x176   : > { %917 = vrot.lane.b32.xlu1 %v619_v27, %s2450_s16  ;;  %v621_v28 = vpop.f32.mrb[55].mxu0  ;;  %v2752_v27 = vand.u32 127, %v680_v21 }
 0x178   : > { %923 = vrot.lane.b32.xlu0 %v617_v26, %s2450_s16  ;;  %vm682_vm0 = vcmp.lt.s32.totalorder %v2752_v27, 17  ;;  %vm731_vm1 = vcmp.lt.s32.totalorder %v2752_v27, 16  ;;  %vm780_vm2 = vcmp.lt.s32.totalorder %v2752_v27, 15  ;;  %vm829_vm3 = vcmp.lt.s32.totalorder %v2752_v27, 1 }
 0x179   : > { %vm878_vm4 = vcmp.lt.s32.totalorder %v2752_v27, 127  ;;  %vm927_vm5 = vcmp.lt.s32.totalorder %v2752_v27, 113  ;;  %vm976_vm6 = vcmp.lt.s32.totalorder %v2752_v27, 112  ;;  %vm1025_vm7 = vcmp.lt.s32.totalorder %v2752_v27, 111  ;;  %v2396_v27 = vld [vmem:[%s3770_s2] sm:$0xff]  }
 0x17a   : > { %925 = vrot.lane.b32.xlu1 %v621_v28, %s2450_s16  ;;  %v693_v28 = vsub.s32 0, %v692_v24 }
 0x17b   : > { %v625_v29 = vpop.f32.mrb[56].mxu0 }
 0x17c   : > { %960 = vrot.lane.b32.xlu0 %v625_v29, %s2451_s19  ;;  %v627_v30 = vpop.f32.mrb[57].mxu0 }
 0x17d   : > { %v629_v31 = vpop.f32.mrb[58].mxu0 }
 0x17e   : > { %v2667_v32 = vpop.permute.xlu0 %664  ;;  %962 = vrot.lane.b32.xlu1 %v629_v31, %s2451_s19  ;;  %v631_v33 = vpop.f32.mrb[59].mxu0  ;;  %v742_v31 = vsub.s32 1, %v692_v24 }
 0x17f   : > { %v2670_v34 = vpop.permute.xlu1 %672 }
 0x180   : > { %968 = vrot.lane.b32.xlu0 %v627_v30, %s2451_s19  ;;  %v259_v30 = vld [vmem:[%s3771_s3] sm:$0xff] }
 0x182   : > { %v2673_v35 = vpop.permute.xlu0 %666  ;;  %970 = vrot.lane.b32.xlu1 %v631_v33, %s2451_s19  ;;  %v260_v33 = vld [vmem:[%s3771_s3 + $0x8] sm:$0xff] }
 0x183   : > { %v2676_v36 = vpop.permute.xlu1 %674  ;;  %v635_v37 = vpop.f32.mrb[60].mxu0 }
 0x184   : > { %964 = vrot.lane.b32.xlu0 %v635_v37, %s2451_s19  ;;  %v637_v38 = vpop.f32.mrb[61].mxu0  ;;  %v688_v21 = vsel %vm682_vm0, %v2676_v36, %v2673_v35 }
 0x185   : > { %v639_v39 = vpop.f32.mrb[62].mxu0 }
 0x186   : > { %v2679_v40 = vpop.permute.xlu0 %668  ;;  %966 = vrot.lane.b32.xlu1 %v639_v39, %s2451_s19  ;;  %v641_v41 = vpop.f32.mrb[63].mxu0 }
 0x188   : > { %v2682_v42 = vpop.permute.xlu1 %670  ;;  %972 = vrot.lane.b32.xlu0 %v637_v38, %s2451_s19  ;;  %v2765_v38 = vrot.slane %v259_v30, %v693_v28 }
 0x18a   : > { %v2685_v43 = vpop.permute.xlu0 %676  ;;  %974 = vrot.lane.b32.xlu1 %v641_v41, %s2451_s19  ;;  %3793 = vst [vmem:[#allocation7_spill] sm:$0xff] %v2765_v38  ;;  %v2769_v41 = vrot.slane %v260_v33, %v693_v28  ;;  %v889_v28 = vsub.s32 5, %v692_v24 }
 0x18b   : > { %v645_v44 = vpop.f32.mrb[64].mxu0 }
 0x18c   : > { %v2688_v45 = vpop.permute.xlu1 %678  ;;  %1009 = vrot.lane.b32.xlu0 %v645_v44, %s2452_s20  ;;  %v647_v46 = vpop.f32.mrb[65].mxu0  ;;  %3795 = vst [vmem:[#allocation9_spill] sm:$0xff] %v2769_v41  ;;  %v2772_v44 = vrot.slane %v259_v30, %v742_v31 }
 0x18d   : > { %v649_v47 = vpop.f32.mrb[66].mxu0 }
 0x18e   : > { %v2691_v48 = vpop.permute.xlu0 %715  ;;  %1011 = vrot.lane.b32.xlu1 %v649_v47, %s2452_s20  ;;  %v651_v49 = vpop.f32.mrb[67].mxu0  ;;  %v683_v47 = vsel %vm682_vm0, %v2667_v32, %v2670_v34 }
 0x190   : > { %v2694_v50 = vpop.permute.xlu1 %717  ;;  %1017 = vrot.lane.b32.xlu0 %v647_v46, %s2452_s20  ;;  %v791_v46 = vsub.s32 2, %v692_v24 }
 0x192   : > { %v2697_v51 = vpop.permute.xlu0 %723  ;;  %1019 = vrot.lane.b32.xlu1 %v651_v49, %s2452_s20  ;;  %v687_v49 = vsel %vm682_vm0, %v2670_v34, %v2667_v32  ;;  %v685_v32 = vsel %vm682_vm0, %v2679_v40, %v2685_v43  ;;  %v689_v34 = vsel %vm682_vm0, %v2685_v43, %v2679_v40 }
 0x193   : > { %v655_v52 = vpop.f32.mrb[68].mxu0  ;;  %v703_v43 = vmul.f32 %v2765_v38, %v689_v34 }
 0x194   : > { %v2700_v53 = vpop.permute.xlu1 %725  ;;  %1013 = vrot.lane.b32.xlu0 %v655_v52, %s2452_s20  ;;  %v657_v54 = vpop.f32.mrb[69].mxu0  ;;  %v2782_v52 = vrot.slane %v260_v33, %v742_v31 }
 0x195   : > { %v659_v55 = vpop.f32.mrb[70].mxu0 }
 0x196   : > { %v2703_v56 = vpop.permute.xlu0 %719  ;;  %1015 = vrot.lane.b32.xlu1 %v659_v55, %s2452_s20  ;;  %v661_v57 = vpop.f32.mrb[71].mxu0 }
 0x198   : > { %v2706_v58 = vpop.permute.xlu1 %721  ;;  %1021 = vrot.lane.b32.xlu0 %v657_v54, %s2452_s20  ;;  %v840_v54 = vsub.s32 3, %v692_v24 }
 0x19a   : > { %v2709_v59 = vpop.permute.xlu0 %727  ;;  %1023 = vrot.lane.b32.xlu1 %v661_v57, %s2452_s20  ;;  %v684_v57 = vsel %vm682_vm0, %v2673_v35, %v2676_v36  ;;  %v700_v35 = vmul.f32 %v2769_v41, %v683_v47  ;;  %v2807_v36 = vrot.slane %v259_v30, %v791_v46  ;;  %v2823_v47 = vrot.slane %v260_v33, %v889_v28 }
 0x19c   : > { %v2712_v60 = vpop.permute.xlu1 %729  ;;  %v708_v34 = vadd.f32 %v700_v35, %v2636_v6  ;;  %v736_v6 = vsel %vm731_vm1, %v2697_v51, %v2691_v48 }
 0x19e   : > { %v2714_v61 = vpop.permute.xlu0 %764 }
 0x1a0   : > { %v2716_v62 = vpop.permute.xlu1 %766 }
 0x1a2   : > { %v2718_v63 = vpop.permute.xlu0 %772 }
 0x1a3   : > { %v785_v35 = vsel %vm780_vm2, %v2718_v63, %v2714_v61 }
 0x1a4   : > { %v2720_v1 = vpop.permute.xlu1 %774 }
 0x1a6   : > { %v2722_v2 = vpop.permute.xlu0 %768 }
 0x1a8   : > { %v2724_v3 = vpop.permute.xlu1 %770 }
 0x1aa   : > { %v2726_v4 = vpop.permute.xlu0 %776 }
 0x1ac   : > { %v2728_v13 = vpop.permute.xlu1 %778 }
 0x1ae   : > { %v2730_v14 = vpop.permute.xlu0 %813 }
 0x1b0   : > { %v2732_v15 = vpop.permute.xlu1 %815 }
 0x1b2   : > { %v2734_v16 = vpop.permute.xlu0 %821 }
 0x1b4   : > { %v2736_v17 = vpop.permute.xlu1 %823 }
 0x1b6   : > { %v2738_v18 = vpop.permute.xlu0 %817 }
 0x1b8   : > { %v2740_v19 = vpop.permute.xlu1 %819 }
 0x1ba   : > { %v2742_v20 = vpop.permute.xlu0 %825 }
 0x1bc   : > { %v2744_v22 = vpop.permute.xlu1 %827 }
 0x1ce   : > { %v2746_v23 = vpop.permute.xlu0 %862 }
 0x1cf   : > { %3788 = vst [vmem:[#allocation2_spill] sm:$0xff] %v2746_v23  ;;  %v2813_v23 = vrot.slane %v259_v30, %v840_v54 }
 0x1d0   : > { %v2748_v25 = vpop.permute.xlu1 %864 }
 0x1d1   : > { %3789 = vst [vmem:[#allocation3_spill] sm:$0xff] %v2748_v25  ;;  %v701_v25 = vmul.f32 %v2765_v38, %v688_v21  ;;  %v2829_v21 = vrot.slane %v260_v33, %v938_v0 }
 0x1d2   : > { %v2750_v26 = vpop.permute.xlu0 %870 }
 0x1d3   : > { %3790 = vst [vmem:[#allocation4_spill] sm:$0xff] %v2750_v26  ;;  %v2815_v26 = vrot.slane %v260_v33, %v840_v54 }
 0x1d4   : > { %v2754_v29 = vpop.permute.xlu1 %872 }
 0x1d5   : > { %3791 = vst [vmem:[#allocation5_spill] sm:$0xff] %v2754_v29  ;;  %v702_v29 = vmul.f32 %v2769_v41, %v684_v57 }
 0x1d6   : > { %v2762_v37 = vpop.permute.xlu0 %866 }
 0x1d7   : > { %3792 = vst [vmem:[#allocation6_spill] sm:$0xff] %v2762_v37  ;;  %v699_v37 = vmul.f32 %v2765_v38, %v687_v49  ;;  %v2821_v49 = vrot.slane %v259_v30, %v889_v28  ;;  %v686_v28 = vsel %vm682_vm0, %v2682_v42, %v2688_v45 }
 0x1d8   : > { %v2767_v39 = vpop.permute.xlu1 %868 }
 0x1d9   : > { %3794 = vst [vmem:[#allocation8_spill] sm:$0xff] %v2767_v39  ;;  %v987_v39 = vsub.s32 7, %v692_v24  ;;  %v704_v24 = vmul.f32 %v2769_v41, %v685_v32  ;;  %v690_v32 = vsel %vm682_vm0, %v2688_v45, %v2682_v42  ;;  %v711_v42 = vadd.f32 %v703_v43, %v2642_v9 }
 0x1da   : > { %v2784_v55 = vpop.permute.xlu0 %874  ;;  %v737_v45 = vsel %vm731_vm1, %v2700_v53, %v2694_v50  ;;  %v734_v9 = vsel %vm731_vm1, %v2703_v56, %v2709_v59 }
 0x1db   : > { %3796 = vst [vmem:[#allocation10_spill] sm:$0xff] %v2784_v55  ;;  %v2809_v55 = vrot.slane %v260_v33, %v791_v46  ;;  %v2831_v57 = vrot.slane %v259_v30, %v987_v39  ;;  %v2833_v54 = vrot.slane %v260_v33, %v987_v39  ;;  %v750_v39 = vmul.f32 %v2772_v44, %v737_v45 }
 0x1dc   : > { %v2803_v31 = vpop.permute.xlu1 %876 }
 0x1dd   : > { %3797 = vst [vmem:[#allocation11_spill] sm:$0xff] %v2803_v31  ;;  %v2827_v31 = vrot.slane %v259_v30, %v938_v0  ;;  %v709_v0 = vadd.f32 %v701_v25, %v2638_v7  ;;  %v710_v30 = vadd.f32 %v702_v29, %v2640_v8  ;;  %v712_v7 = vadd.f32 %v704_v24, %v2644_v10 }
 0x1de   : > { %v2817_v40 = vpop.permute.xlu0 %911  ;;  %v733_v8 = vsel %vm731_vm1, %v2694_v50, %v2700_v53  ;;  %v738_v10 = vsel %vm731_vm1, %v2709_v59, %v2703_v56  ;;  %v748_v29 = vmul.f32 %v2772_v44, %v736_v6  ;;  %v735_v53 = vsel %vm731_vm1, %v2706_v58, %v2712_v60 }
 0x1df   : > { %3798 = vst [vmem:[#allocation12_spill] sm:$0xff] %v2817_v40  ;;  %v707_v40 = vadd.f32 %v699_v37, %v2634_v5  ;;  %v732_v5 = vsel %vm731_vm1, %v2691_v48, %v2697_v51  ;;  %v705_v48 = vmul.f32 %v2765_v38, %v690_v32  ;;  %v706_v51 = vmul.f32 %v2769_v41, %v686_v28 }
 0x1e0   : > { %v2825_v46 = vpop.permute.xlu1 %913  ;;  %v749_v50 = vmul.f32 %v2782_v52, %v732_v5  ;;  %v739_v37 = vsel %vm731_vm1, %v2712_v60, %v2706_v58  ;;  %v751_v56 = vmul.f32 %v2782_v52, %v733_v8  ;;  %v781_v59 = vsel %vm780_vm2, %v2714_v61, %v2718_v63 }
 0x1e1   : > { %v752_v58 = vmul.f32 %v2772_v44, %v738_v10  ;;  %v753_v60 = vmul.f32 %v2782_v52, %v734_v9  ;;  %v782_v24 = vsel %vm780_vm2, %v2716_v62, %v2720_v1  ;;  %v786_v28 = vsel %vm780_vm2, %v2720_v1, %v2716_v62 }
 0x1e2   : > { %v2856_v33 = vpop.permute.xlu0 %919  ;;  %v713_v61 = vadd.f32 %v705_v48, %v2646_v11  ;;  %v714_v63 = vadd.f32 %v706_v51, %v2648_v12  ;;  %v754_v32 = vmul.f32 %v2772_v44, %v739_v37  ;;  %v755_v5 = vmul.f32 %v2782_v52, %v735_v53 }
 0x1e3   : > { %v756_v8 = vadd.f32 %v748_v29, %v707_v40  ;;  %v757_v45 = vadd.f32 %v749_v50, %v708_v34  ;;  %v797_v9 = vmul.f32 %v2807_v36, %v785_v35  ;;  %v798_v10 = vmul.f32 %v2809_v55, %v781_v59 }
 0x1e4   : > { %v2878_v25 = vpop.permute.xlu1 %921  ;;  %v758_v41 = vadd.f32 %v750_v39, %v709_v0  ;;  %v759_v38 = vadd.f32 %v751_v56, %v710_v30  ;;  %v799_v62 = vmul.f32 %v2807_v36, %v786_v28  ;;  %v800_v11 = vmul.f32 %v2809_v55, %v782_v24  ;;  %v3799_v24 = vld [vmem:[#allocation4_spill] sm:$0xff]  ;;  %v3800_v28 = vld [vmem:[#allocation2_spill] sm:$0xff] }
 0x1e5   : > { %v760_v12 = vadd.f32 %v752_v58, %v711_v42  ;;  %v761_v48 = vadd.f32 %v753_v60, %v712_v7  ;;  %v783_v40 = vsel %vm780_vm2, %v2722_v2, %v2726_v4  ;;  %v787_v34 = vsel %vm780_vm2, %v2726_v4, %v2722_v2 }
 0x1e6   : > { %v2901_v43 = vpop.permute.xlu0 %915  ;;  %v762_v0 = vadd.f32 %v754_v32, %v713_v61  ;;  %v763_v30 = vadd.f32 %v755_v5, %v714_v63  ;;  %v784_v51 = vsel %vm780_vm2, %v2724_v3, %v2728_v13  ;;  %v788_v42 = vsel %vm780_vm2, %v2728_v13, %v2724_v3 }
 0x1e7   : > { %v805_v29 = vadd.f32 %v797_v9, %v756_v8  ;;  %v806_v50 = vadd.f32 %v798_v10, %v757_v45  ;;  %v830_v2 = vsel %vm829_vm3, %v2730_v14, %v2734_v16  ;;  %v834_v4 = vsel %vm829_vm3, %v2734_v16, %v2730_v14  ;;  %v3802_v9 = vld [vmem:[#allocation3_spill] sm:$0xff] }
 0x1e8   : > { %v2917_v6 = vpop.permute.xlu1 %917  ;;  %v807_v53 = vadd.f32 %v799_v62, %v758_v41  ;;  %v808_v37 = vadd.f32 %v800_v11, %v759_v38  ;;  %v801_v39 = vmul.f32 %v2807_v36, %v787_v34  ;;  %v802_v3 = vmul.f32 %v2809_v55, %v783_v40 }
 0x1e9   : > { %v803_v56 = vmul.f32 %v2807_v36, %v788_v42  ;;  %v804_v59 = vmul.f32 %v2809_v55, %v784_v51  ;;  %v831_v35 = vsel %vm829_vm3, %v2732_v15, %v2736_v17  ;;  %v835_v14 = vsel %vm829_vm3, %v2736_v17, %v2732_v15 }
 0x1ea   : > { %v2923_v1 = vpop.permute.xlu0 %923  ;;  %v846_v16 = vmul.f32 %v2813_v23, %v834_v4  ;;  %v847_v38 = vmul.f32 %v2815_v26, %v830_v2  ;;  %v832_v41 = vsel %vm829_vm3, %v2738_v18, %v2742_v20  ;;  %v836_v58 = vsel %vm829_vm3, %v2742_v20, %v2738_v18 }
 0x1eb   : > { %v833_v15 = vsel %vm829_vm3, %v2740_v19, %v2744_v22  ;;  %v837_v17 = vsel %vm829_vm3, %v2744_v22, %v2740_v19  ;;  %v879_v61 = vsel %vm878_vm4, %v3800_v28, %v3799_v24  ;;  %v883_v18 = vsel %vm878_vm4, %v3799_v24, %v3800_v28  ;;  %v3801_v22 = vld [vmem:[#allocation5_spill] sm:$0xff] }
 0x1ec   : > { %v2941_v7 = vpop.permute.xlu1 %925  ;;  %v809_v20 = vadd.f32 %v801_v39, %v760_v12  ;;  %v810_v63 = vadd.f32 %v802_v3, %v761_v48  ;;  %v848_v32 = vmul.f32 %v2813_v23, %v835_v14  ;;  %v849_v5 = vmul.f32 %v2815_v26, %v831_v35  ;;  %v3803_v35 = vld [vmem:[#allocation10_spill] sm:$0xff] }
 0x1ed   : > { %v850_v45 = vmul.f32 %v2813_v23, %v836_v58  ;;  %v851_v19 = vmul.f32 %v2815_v26, %v832_v41  ;;  %v880_v10 = vsel %vm878_vm4, %v3802_v9, %v3801_v22  ;;  %v884_v62 = vsel %vm878_vm4, %v3801_v22, %v3802_v9  ;;  %v3804_v14 = vld [vmem:[#allocation6_spill] sm:$0xff] }
 0x1ee   : > { %v961_v13 = vpop.permute.xlu0 %960  ;;  %v852_v11 = vmul.f32 %v2813_v23, %v837_v17  ;;  %v853_v12 = vmul.f32 %v2815_v26, %v833_v15  ;;  %v895_v48 = vmul.f32 %v2821_v49, %v879_v61  ;;  %v896_v40 = vmul.f32 %v2823_v47, %v883_v18  ;;  %v3805_v61 = vld [vmem:[#allocation12_spill] sm:$0xff] }
 0x1ef   : > { %v811_v51 = vadd.f32 %v803_v56, %v762_v0  ;;  %v812_v42 = vadd.f32 %v804_v59, %v763_v30  ;;  %v854_v2 = vadd.f32 %v846_v16, %v805_v29  ;;  %v855_v4 = vadd.f32 %v847_v38, %v806_v50 }
 0x1f0   : > { %v963_v60 = vpop.permute.xlu1 %962  ;;  %v897_v39 = vmul.f32 %v2821_v49, %v880_v10  ;;  %v898_v3 = vmul.f32 %v2823_v47, %v884_v62  ;;  %v881_v41 = vsel %vm878_vm4, %v3804_v14, %v3803_v35  ;;  %v885_v58 = vsel %vm878_vm4, %v3803_v35, %v3804_v14 }
 0x1f1   : > { %v856_v0 = vadd.f32 %v848_v32, %v807_v53  ;;  %v857_v30 = vadd.f32 %v849_v5, %v808_v37  ;;  %v858_v29 = vadd.f32 %v850_v45, %v809_v20  ;;  %v859_v50 = vadd.f32 %v851_v19, %v810_v63  ;;  %v3806_v45 = vld [vmem:[#allocation11_spill] sm:$0xff]  ;;  %v3807_v19 = vld [vmem:[#allocation8_spill] sm:$0xff] }
 0x1f2   : > { %v969_v8 = vpop.permute.xlu0 %968  ;;  %v3019_v56 = vadd.f32 %v852_v11, %v811_v51  ;;  %v3021_v59 = vadd.f32 %v853_v12, %v812_v42  ;;  %v903_v16 = vadd.f32 %v895_v48, %v854_v2  ;;  %v904_v38 = vadd.f32 %v896_v40, %v855_v4 }
 0x1f3   : > { %v899_v24 = vmul.f32 %v2821_v49, %v881_v41  ;;  %v900_v28 = vmul.f32 %v2823_v47, %v885_v58  ;;  %v928_v53 = vsel %vm927_vm5, %v3805_v61, %v2856_v33  ;;  %v932_v37 = vsel %vm927_vm5, %v2856_v33, %v3805_v61 }
 0x1f4   : > { %v971_v34 = vpop.permute.xlu1 %970  ;;  %v905_v18 = vadd.f32 %v897_v39, %v856_v0  ;;  %v906_v20 = vadd.f32 %v898_v3, %v857_v30  ;;  %v929_v63 = vsel %vm927_vm5, %v2825_v46, %v2878_v25  ;;  %v933_v32 = vsel %vm927_vm5, %v2878_v25, %v2825_v46 }
 0x1f5   : > { %v882_v22 = vsel %vm878_vm4, %v3807_v19, %v3806_v45  ;;  %v886_v33 = vsel %vm878_vm4, %v3806_v45, %v3807_v19  ;;  %v977_v9 = vsel %vm976_vm6, %v961_v13, %v969_v8  ;;  %v981_v10 = vsel %vm976_vm6, %v969_v8, %v961_v13 }
 0x1f6   : > { %v3017_v15 = vpop.permute.xlu0 %964  ;;  %v944_v62 = vmul.f32 %v2827_v31, %v928_v53  ;;  %v945_v46 = vmul.f32 %v2829_v21, %v932_v37  ;;  %v978_v25 = vsel %vm976_vm6, %v963_v60, %v971_v34  ;;  %v982_v11 = vsel %vm976_vm6, %v971_v34, %v963_v60 }
 0x1f7   : > { %v907_v48 = vadd.f32 %v899_v24, %v858_v29  ;;  %v908_v40 = vadd.f32 %v900_v28, %v859_v50  ;;  %v946_v51 = vmul.f32 %v2827_v31, %v929_v63  ;;  %v947_v42 = vmul.f32 %v2829_v21, %v933_v32 }
 0x1f8   : > { %v967_v17 = vpop.permute.xlu1 %966  ;;  %v930_v13 = vsel %vm927_vm5, %v2901_v43, %v2923_v1  ;;  %v934_v8 = vsel %vm927_vm5, %v2923_v1, %v2901_v43  ;;  %v993_v2 = vmul.f32 %v2831_v57, %v977_v9  ;;  %v994_v60 = vmul.f32 %v2833_v54, %v981_v10 }
 0x1f9   : > { %v931_v4 = vsel %vm927_vm5, %v2917_v6, %v2941_v7  ;;  %v935_v39 = vsel %vm927_vm5, %v2941_v7, %v2917_v6  ;;  %v995_v3 = vmul.f32 %v2831_v57, %v978_v25  ;;  %v996_v35 = vmul.f32 %v2833_v54, %v982_v11  ;;  %v2203_v6 = vld [vmem:[%s3771_s3 + $0x10] ss:$0 sm:$0xff]  ;;  %v2204_v7 = vld [vmem:[%s3771_s3 + $0x18] ss:$0 sm:$0xff] }
 0x1fa   : > { %v973_v5 = vpop.permute.xlu0 %972  ;;  %v901_v43 = vmul.f32 %v2821_v49, %v882_v22  ;;  %v902_v1 = vmul.f32 %v2823_v47, %v886_v33  ;;  %v952_v14 = vadd.f32 %v944_v62, %v903_v16  ;;  %v953_v41 = vadd.f32 %v945_v46, %v904_v38 }
 0x1fb   : > { %v954_v0 = vadd.f32 %v946_v51, %v905_v18  ;;  %v955_v30 = vadd.f32 %v947_v42, %v906_v20  ;;  %v948_v29 = vmul.f32 %v2827_v31, %v930_v13  ;;  %v949_v50 = vmul.f32 %v2829_v21, %v934_v8 }
 0x1fc   : > { %v975_v12 = vpop.permute.xlu1 %974  ;;  %v950_v24 = vmul.f32 %v2827_v31, %v931_v4  ;;  %v951_v16 = vmul.f32 %v2829_v21, %v935_v39  ;;  %v1001_v38 = vadd.f32 %v993_v2, %v952_v14  ;;  %v1002_v61 = vadd.f32 %v994_v60, %v953_v41 }
 0x1fd   : > { %v1003_v53 = vadd.f32 %v995_v3, %v954_v0  ;;  %v1004_v20 = vadd.f32 %v996_v35, %v955_v30  ;;  %v979_v63 = vsel %vm976_vm6, %v3017_v15, %v973_v5  ;;  %v983_v32 = vsel %vm976_vm6, %v973_v5, %v3017_v15 }
 0x1fe   : > { %v1010_v34 = vpop.permute.xlu0 %1009  ;;  %v980_v33 = vsel %vm976_vm6, %v967_v17, %v975_v12  ;;  %v984_v9 = vsel %vm976_vm6, %v975_v12, %v967_v17  ;;  %v909_v5 = vadd.f32 %v901_v43, %v3019_v56  ;;  %v910_v42 = vadd.f32 %v902_v1, %v3021_v59 }
 0x1ff   : > { %v997_v13 = vmul.f32 %v2831_v57, %v979_v63  ;;  %v998_v8 = vmul.f32 %v2833_v54, %v983_v32  ;;  %v956_v17 = vadd.f32 %v948_v29, %v907_v48  ;;  %v957_v12 = vadd.f32 %v949_v50, %v908_v40 }
 0x200   : > { %v1012_v58 = vpop.permute.xlu1 %1011  ;;  %v958_v4 = vadd.f32 %v950_v24, %v909_v5  ;;  %v959_v39 = vadd.f32 %v951_v16, %v910_v42  ;;  %v999_v3 = vmul.f32 %v2831_v57, %v980_v33  ;;  %v1000_v35 = vmul.f32 %v2833_v54, %v984_v9  ;;  %v2222_v16 = vld [vmem:[%s2496_s21 + $0x108] sm:$0xff]  ;;  %v2221_v9 = vld [vmem:[%s2496_s21 + $0x100] sm:$0xff] }
 0x201   : > { %v1005_v41 = vadd.f32 %v997_v13, %v956_v17 }
 0x202   : > { %v1018_v28 = vpop.permute.xlu0 %1017 }
 0x203   : > { %v1026_v37 = vsel %vm1025_vm7, %v1010_v34, %v1018_v28  ;;  %v1030_v18 = vsel %vm1025_vm7, %v1018_v28, %v1010_v34  ;;  %v1007_v28 = vadd.f32 %v999_v3, %v958_v4  ;;  %v2336_v4 = vld [vmem:[%s3770_s2] sm:$0xff]  }
 0x204   : > { %v1042_v45 = vmul.f32 %v2203_v6, %v1026_v37  ;;  %v1043_v19 = vmul.f32 %v2204_v7, %v1030_v18  ;;  %v1020_v22 = vpop.permute.xlu1 %1019 }
 0x205   : > { %v1027_v10 = vsel %vm1025_vm7, %v1012_v58, %v1020_v22  ;;  %v1031_v62 = vsel %vm1025_vm7, %v1020_v22, %v1012_v58  ;;  %v1006_v58 = vadd.f32 %v998_v8, %v957_v12  ;;  %v2225_v12 = vld [vmem:[%s2496_s21 + $0x120] sm:$0xff] }
 0x206   : > { %v1044_v46 = vmul.f32 %v2203_v6, %v1027_v10  ;;  %v1045_v25 = vmul.f32 %v2204_v7, %v1031_v62  ;;  %v1014_v11 = vpop.permute.xlu0 %1013  ;;  %v1051_v51 = vadd.f32 %v1043_v19, %v1002_v61  ;;  %v1050_v15 = vadd.f32 %v1042_v45, %v1001_v38  ;;  %v2224_v38 = vld [vmem:[%s2496_s21 + $0x118] sm:$0xff]  ;;  %v2223_v10 = vld [vmem:[%s2496_s21 + $0x110] sm:$0xff]  ;;  %v2226_v62 = vld [vmem:[%s2496_s21 + $0x128] sm:$0xff] }
 0x207   : > { %v1008_v61 = vadd.f32 %v1000_v35, %v959_v39  ;;  %v1346_v45 = vmax.f32 %v2222_v16, 0.0  ;;  %v1348_v19 = vmax.f32 %v2224_v38, 0.0  ;;  %v1347_v5 = vmax.f32 %v2223_v10, 0.0  ;;  %v2233_v16 = vld [vmem:[%s2496_s21 + $0x160] sm:$0xff]  ;;  %v2235_v38 = vld [vmem:[%s2496_s21 + $0x170] sm:$0xff] }
 0x208   : > { %v1016_v2 = vpop.permute.xlu1 %1015  ;;  %v1053_v60 = vadd.f32 %v1045_v25, %v1004_v20  ;;  %v1052_v34 = vadd.f32 %v1044_v46, %v1003_v53  ;;  %v1059_v43 = vmax.f32 %v1051_v51, 0.0  ;;  %v1058_v1 = vmax.f32 %v1050_v15, 0.0  ;;  %v2228_v46 = vld [vmem:[%s2496_s21 + $0x138] sm:$0xff] }
 0x209   : > { %v1350_v8 = vmax.f32 %v2226_v62, 0.0  ;;  %v1352_v17 = vmax.f32 %v2228_v46, 0.0  ;;  %v1349_v3 = vmax.f32 %v2225_v12, 0.0 }
 0x20a   : > { %v1022_v56 = vpop.permute.xlu0 %1021  ;;  %v1061_v59 = vmax.f32 %v1053_v60, 0.0  ;;  %v1060_v14 = vmax.f32 %v1052_v34, 0.0  ;;  %v2230_v60 = vld [vmem:[%s2496_s21 + $0x148] sm:$0xff]  ;;  %v2232_v34 = vld [vmem:[%s2496_s21 + $0x158] sm:$0xff] }
 0x20b   : > { %v1028_v48 = vsel %vm1025_vm7, %v1014_v11, %v1022_v56  ;;  %v1032_v40 = vsel %vm1025_vm7, %v1022_v56, %v1014_v11  ;;  %v1380_v56 = vpack.c.bf16 %v1352_v17, %v1350_v8 }
 0x20c   : > { %v1046_v0 = vmul.f32 %v2203_v6, %v1028_v48  ;;  %v1047_v30 = vmul.f32 %v2204_v7, %v1032_v40  ;;  %v1024_v29 = vpop.permute.xlu1 %1023  ;;  %v1067_v50 = vpack.c.bf16 %v1061_v59, %v1059_v43  ;;  %v1066_v24 = vpack.c.bf16 %v1060_v14, %v1058_v1  ;;  %v2229_v1 = vld [vmem:[%s2496_s21 + $0x140] sm:$0xff]  ;;  %v2231_v14 = vld [vmem:[%s2496_s21 + $0x150] sm:$0xff] }
 0x20d   : > { %v1029_v53 = vsel %vm1025_vm7, %v1016_v2, %v1024_v29  ;;  %v1033_v37 = vsel %vm1025_vm7, %v1024_v29, %v1016_v2  ;;  %v2227_v2 = vld [vmem:[%s2496_s21 + $0x130] sm:$0xff]  ;;  %v1354_v43 = vmax.f32 %v2230_v60, 0.0  ;;  %v1356_v59 = vmax.f32 %v2232_v34, 0.0  ;;  %v2245_v34 = vld [vmem:[%s2496_s21 + $0x1c0] sm:$0xff] }
 0x20e   : > { %v1054_v18 = vadd.f32 %v1046_v0, %v1005_v41  ;;  %v1055_v20 = vadd.f32 %v1047_v30, %v1006_v58  ;;  %v1048_v63 = vmul.f32 %v2203_v6, %v1029_v53  ;;  %v1049_v32 = vmul.f32 %v2204_v7, %v1033_v37  ;;  %1135 = vmatprep.subr.bf16.mxu1 %v1067_v50  ;;  %v2234_v41 = vld [vmem:[%s2496_s21 + $0x168] sm:$0xff]  ;;  %v2236_v58 = vld [vmem:[%s2496_s21 + $0x178] sm:$0xff] }
 0x20f   : > { %1136 = vmatpush1.bf16.msra.mxu1 %v1066_v24  ;;  %v1378_v6 = vpack.c.bf16 %v1348_v19, %v1346_v45  ;;  %v1345_v7 = vmax.f32 %v2221_v9, 0.0  ;;  %v1351_v35 = vmax.f32 %v2227_v2, 0.0  ;;  %v3808_v48 = vmov 0   ;;  %v2337_v53 = vld [vmem:[%s3770_s2 + $0x8] sm:$0xff]   ;;  %v2237_v19 = vld [vmem:[%s2496_s21 + $0x180] sm:$0xff]  ;;  %v2244_v9 = vld [vmem:[%s2496_s21 + $0x1b8] sm:$0xff] }
 0x210   : > { %v1056_v22 = vadd.f32 %v1048_v63, %v1007_v28  ;;  %v1057_v33 = vadd.f32 %v1049_v32, %v1008_v61  ;;  %v1062_v25 = vmax.f32 %v1054_v18, 0.0  ;;  %v1063_v11 = vmax.f32 %v1055_v20, 0.0  ;;  %v2238_v28 = vld [vmem:[%s2496_s21 + $0x188] sm:$0xff]  ;;  %v2240_v61 = vld [vmem:[%s2496_s21 + $0x198] sm:$0xff] }
 0x211   : > { %v1377_v39 = vpack.c.bf16 %v1347_v5, %v1345_v7  ;;  %v1379_v40 = vpack.c.bf16 %v1351_v35, %v1349_v3  ;;  %v1353_v0 = vmax.f32 %v2229_v1, 0.0  ;;  %v1355_v30 = vmax.f32 %v2231_v14, 0.0  ;;  %v2246_v7 = vld [vmem:[%s2496_s21 + $0x1c8] sm:$0xff]  ;;  %v2248_v5 = vld [vmem:[%s2496_s21 + $0x1d8] sm:$0xff] }
 0x212   : > { %v1064_v51 = vmax.f32 %v1056_v22, 0.0  ;;  %v1065_v15 = vmax.f32 %v1057_v33, 0.0  ;;  %v1382_v29 = vpack.c.bf16 %v1356_v59, %v1354_v43  ;;  %v1358_v50 = vmax.f32 %v2234_v41, 0.0  ;;  %v2239_v22 = vld [vmem:[%s2496_s21 + $0x190] sm:$0xff]  ;;  %v2242_v33 = vld [vmem:[%s2496_s21 + $0x1a8] sm:$0xff]  ;;  %v2252_v3 = vld [vmem:[%s2496_s21 + $0x1f8] sm:$0xff] }
 0x213   : > { %v1360_v24 = vmax.f32 %v2236_v58, 0.0  ;;  %v1381_v37 = vpack.c.bf16 %v1355_v30, %v1353_v0  ;;  %v1357_v18 = vmax.f32 %v2233_v16, 0.0  ;;  %v1359_v20 = vmax.f32 %v2235_v38, 0.0  ;;  %v2249_v41 = vld [vmem:[%s2496_s21 + $0x1e0] sm:$0xff]  ;;  %v2251_v58 = vld [vmem:[%s2496_s21 + $0x1f0] sm:$0xff]  ;;  %v2341_v38 = vld [vmem:[%s3770_s2 + $0x28] sm:$0xff]  }
 0x214   : > { %v1069_v42 = vpack.c.bf16 %v1065_v15, %v1063_v11  ;;  %v1068_v13 = vpack.c.bf16 %v1064_v51, %v1062_v25  ;;  %v1362_v32 = vmax.f32 %v2238_v28, 0.0  ;;  %v1364_v45 = vmax.f32 %v2240_v61, 0.0  ;;  %v2241_v15 = vld [vmem:[%s2496_s21 + $0x1a0] sm:$0xff]  ;;  %v2342_v28 = vld [vmem:[%s3770_s2 + $0x30] sm:$0xff]   ;;  %v2343_v61 = vld [vmem:[%s3770_s2 + $0x38] sm:$0xff]  }
 0x215   : > { %v1384_v63 = vpack.c.bf16 %v1360_v24, %v1358_v50  ;;  %v1383_v10 = vpack.c.bf16 %v1359_v20, %v1357_v18  ;;  %v1361_v62 = vmax.f32 %v2237_v19, 0.0  ;;  %v1363_v46 = vmax.f32 %v2239_v22, 0.0  ;;  %v2340_v16 = vld [vmem:[%s3770_s2 + $0x20] sm:$0xff]   ;;  %v2346_v18 = vld [vmem:[%s3769_s1 + $0x10] sm:$0xff]   ;;  %v2347_v20 = vld [vmem:[%s3769_s1 + $0x18] sm:$0xff]  }
 0x216   : > { %1137 = vmatprep.subr.bf16.mxu1 %v1069_v42  ;;  %v1386_v25 = vpack.c.bf16 %v1364_v45, %v1362_v32  ;;  %v1366_v11 = vmax.f32 %v2242_v33, 0.0  ;;  %v1368_v51 = vmax.f32 %v2244_v9, 0.0  ;;  %v2338_v42 = vld [vmem:[%s3770_s2 + $0x10] sm:$0xff]   ;;  %v1365_v8 = vmax.f32 %v2241_v15, 0.0  ;;  %v2349_v32 = vld [vmem:[%s3769_s1 + $0x28] sm:$0xff]   ;;  %v2351_v19 = vld [vmem:[%s3769_s1 + $0x38] sm:$0xff]  }
 0x217   : > { %1138 = vmatpush1.bf16.msra.mxu1 %v1068_v13  ;;  %v1385_v13 = vpack.c.bf16 %v1363_v46, %v1361_v62  ;;  %v1370_v2 = vmax.f32 %v2246_v7, 0.0  ;;  %v1372_v60 = vmax.f32 %v2248_v5, 0.0  ;;  %v1376_v14 = vmax.f32 %v2252_v3, 0.0  ;;  %v2350_v45 = vld [vmem:[%s3769_s1 + $0x30] sm:$0xff]   ;;  %v2352_v22 = vld [vmem:[%s3769_s1 + $0x40] sm:$0xff]   ;;  %v2353_v33 = vld [vmem:[%s3769_s1 + $0x48] sm:$0xff]  }
 0x218   : > { %1393 = vmatprep.subr.bf16.mxu1 %v1378_v6  ;;  %v2243_v6 = vld [vmem:[%s2496_s21 + $0x1b0] sm:$0xff]  ;;  %v1388_v12 = vpack.c.bf16 %v1368_v51, %v1366_v11  ;;  %v1373_v30 = vmax.f32 %v2249_v41, 0.0  ;;  %v2356_v62 = vld [vmem:[%s3769_s1 + $0x60] sm:$0xff]   ;;  %v2357_v46 = vld [vmem:[%s3769_s1 + $0x68] sm:$0xff]  }
 0x219   : > { %v1367_v17 = vmax.f32 %v2243_v6, 0.0  ;;  %v1390_v59 = vpack.c.bf16 %v1372_v60, %v1370_v2  ;;  %v2354_v9 = vld [vmem:[%s3769_s1 + $0x50] sm:$0xff]   ;;  %v2359_v11 = vld [vmem:[%s3769_s1 + $0x78] sm:$0xff]   ;;  %v2360_v51 = vld [vmem:[%s3769_s1 + $0x80] sm:$0xff]  }
 0x21a   : > { %2213 = vmatmul.mubr.msk.bf16.vlgmr.msra.gmra.mrb[0].mxu1 %vm1110_vm8, %v2336_v4  ;;  %v2247_v4 = vld [vmem:[%s2496_s21 + $0x1d0] sm:$0xff]  ;;  %v2361_v15 = vld [vmem:[%s3769_s1 + $0x88] sm:$0xff]   ;;  %v2362_v7 = vld [vmem:[%s2496_s21] sm:$0xff] }
 0x21b   : > { %1177 = vmatprep.mubr.bf16.mxu1 %v3808_v48  ;;  %1394 = vmatpush1.bf16.msra.mxu1 %v1377_v39  ;;  %v2250_v39 = vld [vmem:[%s2496_s21 + $0x1e8] sm:$0xff]  ;;  %v1387_v35 = vpack.c.bf16 %v1367_v17, %v1365_v8  ;;  %v1371_v43 = vmax.f32 %v2247_v4, 0.0  ;;  %v2366_v3 = vld [vmem:[%s2496_s21 + $0x20] sm:$0xff] }
 0x21c   : > { %1395 = vmatprep.subr.bf16.mxu1 %v1380_v56  ;;  %v1369_v56 = vmax.f32 %v2245_v34, 0.0  ;;  %v1374_v1 = vmax.f32 %v2250_v39, 0.0  ;;  %v2365_v34 = vld [vmem:[%s2496_s21 + $0x18] sm:$0xff] }
 0x21e   : > { %v1389_v0 = vpack.c.bf16 %v1371_v43, %v1369_v56  ;;  %v1392_v50 = vpack.c.bf16 %v1376_v14, %v1374_v1  ;;  %v2367_v43 = vld [vmem:[%s2496_s21 + $0x28] sm:$0xff]  ;;  %v2368_v14 = vld [vmem:[%s2496_s21 + $0x30] sm:$0xff] }
 0x21f   : > { %1396 = vmatpush1.bf16.msra.mxu1 %v1379_v40  ;;  %v2339_v40 = vld [vmem:[%s3770_s2 + $0x18] sm:$0xff]  }
 0x220   : > { %1397 = vmatprep.subr.bf16.mxu1 %v1382_v29  ;;  %v1375_v29 = vmax.f32 %v2251_v58, 0.0 }
 0x222   : > { %2214 = vmatmul.mubr.msk.bf16.gmra.mrb[4].mxu1 %vm1110_vm8, %v2337_v53  ;;  %v1391_v24 = vpack.c.bf16 %v1375_v29, %v1373_v30  ;;  %v2344_v53 = vld [vmem:[%s3769_s1] sm:$0xff]  }
 0x223   : > { %1187 = vmatprep.mubr.bf16.mxu1 %v3808_v48  ;;  %1398 = vmatpush1.bf16.msra.mxu1 %v1381_v37  ;;  %v2345_v37 = vld [vmem:[%s3769_s1 + $0x8] sm:$0xff]   ;;  %v2370_v29 = vld [vmem:[%s2496_s21 + $0x40] sm:$0xff] }
 0x224   : > { %1399 = vmatprep.subr.bf16.mxu1 %v1384_v63  ;;  %v2348_v63 = vld [vmem:[%s3769_s1 + $0x20] sm:$0xff]  }
 0x227   : > { %1400 = vmatpush1.bf16.msra.mxu1 %v1383_v10  ;;  %v2355_v10 = vld [vmem:[%s3769_s1 + $0x58] sm:$0xff]  }
 0x228   : > { %1401 = vmatprep.subr.bf16.mxu1 %v1386_v25  ;;  %v2358_v25 = vld [vmem:[%s3769_s1 + $0x70] sm:$0xff]  }
 0x22a   : > { %2215 = vmatmul.mubr.msk.bf16.gmra.mrb[8].mxu1 %vm1110_vm8, %v2338_v42 }
 0x22b   : > { %1197 = vmatprep.mubr.bf16.mxu1 %v3808_v48  ;;  %1402 = vmatpush1.bf16.msra.mxu1 %v1385_v13  ;;  %v2363_v13 = vld [vmem:[%s2496_s21 + $0x8] sm:$0xff] }
 0x22c   : > { %1403 = vmatprep.subr.bf16.mxu1 %v1388_v12  ;;  %v2364_v12 = vld [vmem:[%s2496_s21 + $0x10] sm:$0xff] }
 0x22f   : > { %1404 = vmatpush1.bf16.msra.mxu1 %v1387_v35 }
 0x230   : > { %1405 = vmatprep.subr.bf16.mxu1 %v1390_v59 }
 0x232   : > { %2216 = vmatmul.mubr.msk.bf16.gmra.mrb[12].mxu1 %vm1110_vm8, %v2339_v40  ;;  %v2369_v40 = vld [vmem:[%s2496_s21 + $0x38] sm:$0xff] }
 0x233   : > { %1207 = vmatprep.mubr.bf16.mxu1 %v3808_v48  ;;  %1406 = vmatpush1.bf16.msra.mxu1 %v1389_v0 }
 0x234   : > { %1407 = vmatprep.subr.bf16.mxu1 %v1392_v50 }
 0x237   : > { %1408 = vmatpush1.bf16.msra.mxu1 %v1391_v24 }
 0x23a   : > { %2217 = vmatmul.mubr.msk.bf16.gmra.mrb[16].mxu1 %vm1110_vm8, %v2340_v16  ;;  %v2371_v16 = vld [vmem:[%s2496_s21 + $0x48] sm:$0xff] }
 0x23b   : > { %1217 = vmatprep.mubr.bf16.mxu1 %v3808_v48 }
 0x242   : > { %2218 = vmatmul.mubr.msk.bf16.gmra.mrb[20].mxu1 %vm1110_vm8, %v2341_v38 }
 0x243   : > { %1227 = vmatprep.mubr.bf16.mxu1 %v3808_v48 }
 0x24a   : > { %2219 = vmatmul.mubr.msk.bf16.gmra.mrb[24].mxu1 %vm1110_vm8, %v2342_v28 }
 0x24b   : > { %1237 = vmatprep.mubr.bf16.mxu1 %v3808_v48 }
 0x252   : > { %2220 = vmatmul.mubr.msk.bf16.gmra.mrb[28].mxu1 %vm1110_vm8, %v2343_v61  ;;  %v2372_v61 = vld [vmem:[%s2496_s21 + $0x50] sm:$0xff] }
 0x253   : > { %1425 = vmatprep.mubr.bf16.mxu1 %v3808_v48 }
 0x25a   : > { %1426 = vmatmul.mubr.bf16.vlgmr.msra.gmra.mrb[32].mxu1 %v2344_v53 }
 0x25b   : > { %1435 = vmatprep.mubr.bf16.mxu1 %v3808_v48 }
 0x262   : > { %1436 = vmatmul.mubr.bf16.gmra.mrb[36].mxu1 %v2345_v37 }
 0x263   : > { %1445 = vmatprep.mubr.bf16.mxu1 %v3808_v48 }
 0x26a   : > { %1446 = vmatmul.mubr.bf16.gmra.mrb[40].mxu1 %v2346_v18  ;;  %v2373_v18 = vld [vmem:[%s2496_s21 + $0x58] sm:$0xff] }
 0x26b   : > { %1455 = vmatprep.mubr.bf16.mxu1 %v3808_v48 }
 0x272   : > { %1456 = vmatmul.mubr.bf16.gmra.mrb[44].mxu1 %v2347_v20 }
 0x273   : > { %1465 = vmatprep.mubr.bf16.mxu1 %v3808_v48 }
 0x27a   : > { %1466 = vmatmul.mubr.bf16.gmra.mrb[48].mxu1 %v2348_v63 }
 0x27b   : > { %1475 = vmatprep.mubr.bf16.mxu1 %v3808_v48 }
 0x282   : > { %1476 = vmatmul.mubr.bf16.gmra.mrb[52].mxu1 %v2349_v32  ;;  %v2374_v32 = vld [vmem:[%s2496_s21 + $0x60] sm:$0xff] }
 0x283   : > { %1485 = vmatprep.mubr.bf16.mxu1 %v3808_v48 }
 0x28a   : > { %1486 = vmatmul.mubr.bf16.gmra.mrb[56].mxu1 %v2350_v45 }
 0x28b   : > { %1495 = vmatprep.mubr.bf16.mxu1 %v3808_v48 }
 0x292   : > { %1496 = vmatmul.mubr.bf16.gmra.mrb[60].mxu1 %v2351_v19 }
 0x293   : > { %1505 = vmatprep.mubr.bf16.mxu1 %v3808_v48 }
 0x29a   : > { %1506 = vmatmul.mubr.bf16.gmra.mrb[64].mxu1 %v2352_v22  ;;  %v2375_v22 = vld [vmem:[%s2496_s21 + $0x68] sm:$0xff] }
 0x29b   : > { %1515 = vmatprep.mubr.bf16.mxu1 %v3808_v48 }
 0x2a2   : > { %1516 = vmatmul.mubr.bf16.gmra.mrb[68].mxu1 %v2353_v33 }
 0x2a3   : > { %1525 = vmatprep.mubr.bf16.mxu1 %v3808_v48 }
 0x2aa   : > { %1526 = vmatmul.mubr.bf16.gmra.mrb[72].mxu1 %v2354_v9 }
 0x2ab   : > { %1535 = vmatprep.mubr.bf16.mxu1 %v3808_v48 }
 0x2b2   : > { %1536 = vmatmul.mubr.bf16.gmra.mrb[76].mxu1 %v2355_v10  ;;  %v2376_v10 = vld [vmem:[%s2496_s21 + $0x70] sm:$0xff] }
 0x2b3   : > { %1545 = vmatprep.mubr.bf16.mxu1 %v3808_v48 }
 0x2ba   : > { %1546 = vmatmul.mubr.bf16.gmra.mrb[80].mxu1 %v2356_v62 }
 0x2bb   : > { %1555 = vmatprep.mubr.bf16.mxu1 %v3808_v48 }
 0x2c2   : > { %1556 = vmatmul.mubr.bf16.gmra.mrb[84].mxu1 %v2357_v46 }
 0x2c3   : > { %1565 = vmatprep.mubr.bf16.mxu1 %v3808_v48 }
 0x2ca   : > { %1566 = vmatmul.mubr.bf16.gmra.mrb[88].mxu1 %v2358_v25  ;;  %v2377_v25 = vld [vmem:[%s2496_s21 + $0x78] sm:$0xff] }
 0x2cb   : > { %1575 = vmatprep.mubr.bf16.mxu1 %v3808_v48 }
 0x2d2   : > { %1576 = vmatmul.mubr.bf16.gmra.mrb[92].mxu1 %v2359_v11 }
 0x2d3   : > { %1585 = vmatprep.mubr.bf16.mxu1 %v3808_v48 }
 0x2da   : > { %1586 = vmatmul.mubr.bf16.gmra.mrb[96].mxu1 %v2360_v51 }
 0x2db   : > { %1595 = vmatprep.mubr.bf16.mxu1 %v3808_v48 }
 0x2e2   : > { %1596 = vmatmul.mubr.bf16.gmra.mrb[100].mxu1 %v2361_v15  ;;  %v2378_v15 = vld [vmem:[%s2496_s21 + $0x80] sm:$0xff] }
 0x2e3   : > { %2040 = vmatprep.mubr.bf16.mxu1 %v3808_v48 }
 0x2ed   : > { %v1169_v6 = vpop.f32.mrb[0].mxu1 }
 0x2ee   : > { %v1248_v5 = vadd.f32 %v2362_v7, %v1169_v6  ;;  %v1171_v42 = vpop.f32.mrb[1].mxu1 }
 0x2ef   : > { %v1249_v8 = vadd.f32 %v2363_v13, %v1171_v42  ;;  %v1173_v17 = vpop.f32.mrb[2].mxu1 }
 0x2f0   : > { %1280 = vst [vmem:[%s3275_s28] sm:$0xff] %v1248_v5  ;;  %v1250_v2 = vadd.f32 %v2364_v12, %v1173_v17  ;;  %v1175_v60 = vpop.f32.mrb[3].mxu1  ;;  %v2379_v5 = vld [vmem:[%s2496_s21 + $0x88] sm:$0xff] }
 0x2f1   : > { %1281 = vst [vmem:[%s3275_s28 + $0x8] sm:$0xff] %v1249_v8  ;;  %v1251_v4 = vadd.f32 %v2365_v34, %v1175_v60  ;;  %v2380_v8 = vld [vmem:[%s2496_s21 + $0x90] sm:$0xff] }
 0x2f2   : > { %1282 = vst [vmem:[%s3275_s28 + $0x10] sm:$0xff] %v1250_v2  ;;  %v2381_v2 = vld [vmem:[%s2496_s21 + $0x98] sm:$0xff] }
 0x2f3   : > { %1283 = vst [vmem:[%s3275_s28 + $0x18] sm:$0xff] %v1251_v4  ;;  %v2382_v4 = vld [vmem:[%s2496_s21 + $0xa0] sm:$0xff] }
 0x2f5   : > { %v1179_v39 = vpop.f32.mrb[4].mxu1 }
 0x2f6   : > { %v1252_v35 = vadd.f32 %v2366_v3, %v1179_v39  ;;  %v1181_v56 = vpop.f32.mrb[5].mxu1 }
 0x2f7   : > { %v1253_v59 = vadd.f32 %v2367_v43, %v1181_v56  ;;  %v1183_v1 = vpop.f32.mrb[6].mxu1 }
 0x2f8   : > { %1284 = vst [vmem:[%s3275_s28 + $0x20] sm:$0xff] %v1252_v35  ;;  %v1254_v41 = vadd.f32 %v2368_v14, %v1183_v1  ;;  %v1185_v58 = vpop.f32.mrb[7].mxu1  ;;  %v2383_v35 = vld [vmem:[%s2496_s21 + $0xa8] sm:$0xff] }
 0x2f9   : > { %1285 = vst [vmem:[%s3275_s28 + $0x28] sm:$0xff] %v1253_v59  ;;  %v1255_v0 = vadd.f32 %v2369_v40, %v1185_v58  ;;  %v2384_v59 = vld [vmem:[%s2496_s21 + $0xb0] sm:$0xff] }
 0x2fa   : > { %1286 = vst [vmem:[%s3275_s28 + $0x30] sm:$0xff] %v1254_v41  ;;  %v2385_v41 = vld [vmem:[%s2496_s21 + $0xb8] sm:$0xff] }
 0x2fb   : > { %1287 = vst [vmem:[%s3275_s28 + $0x38] sm:$0xff] %v1255_v0  ;;  %v2386_v0 = vld [vmem:[%s2496_s21 + $0xc0] sm:$0xff] }
 0x2fd   : > { %v1189_v30 = vpop.f32.mrb[8].mxu1 }
 0x2fe   : > { %v1256_v50 = vadd.f32 %v2370_v29, %v1189_v30  ;;  %v1191_v24 = vpop.f32.mrb[9].mxu1 }
 0x2ff   : > { %v1257_v38 = vadd.f32 %v2371_v16, %v1191_v24  ;;  %v1193_v28 = vpop.f32.mrb[10].mxu1 }
 0x300   : > { %1288 = vst [vmem:[%s3275_s28 + $0x40] sm:$0xff] %v1256_v50  ;;  %v1258_v53 = vadd.f32 %v2372_v61, %v1193_v28  ;;  %v1195_v37 = vpop.f32.mrb[11].mxu1  ;;  %v2387_v50 = vld [vmem:[%s2496_s21 + $0xc8] sm:$0xff] }
 0x301   : > { %1289 = vst [vmem:[%s3275_s28 + $0x48] sm:$0xff] %v1257_v38  ;;  %v1259_v20 = vadd.f32 %v2373_v18, %v1195_v37  ;;  %v2388_v38 = vld [vmem:[%s2496_s21 + $0xd0] sm:$0xff] }
 0x302   : > { %1290 = vst [vmem:[%s3275_s28 + $0x50] sm:$0xff] %v1258_v53  ;;  %v2389_v53 = vld [vmem:[%s2496_s21 + $0xd8] sm:$0xff] }
 0x303   : > { %1291 = vst [vmem:[%s3275_s28 + $0x58] sm:$0xff] %v1259_v20  ;;  %v2390_v20 = vld [vmem:[%s2496_s21 + $0xe0] sm:$0xff] }
 0x305   : > { %v1199_v63 = vpop.f32.mrb[12].mxu1 }
 0x306   : > { %v1260_v45 = vadd.f32 %v2374_v32, %v1199_v63  ;;  %v1201_v19 = vpop.f32.mrb[13].mxu1 }
 0x307   : > { %v1261_v33 = vadd.f32 %v2375_v22, %v1201_v19  ;;  %v1203_v9 = vpop.f32.mrb[14].mxu1 }
 0x308   : > { %1292 = vst [vmem:[%s3275_s28 + $0x60] sm:$0xff] %v1260_v45  ;;  %v1262_v62 = vadd.f32 %v2376_v10, %v1203_v9  ;;  %v1205_v46 = vpop.f32.mrb[15].mxu1  ;;  %v2391_v45 = vld [vmem:[%s2496_s21 + $0xe8] sm:$0xff] }
 0x309   : > { %1293 = vst [vmem:[%s3275_s28 + $0x68] sm:$0xff] %v1261_v33  ;;  %v1263_v11 = vadd.f32 %v2377_v25, %v1205_v46  ;;  %v2392_v33 = vld [vmem:[%s2496_s21 + $0xf0] sm:$0xff] }
 0x30a   : > { %1294 = vst [vmem:[%s3275_s28 + $0x70] sm:$0xff] %v1262_v62  ;;  %v2393_v62 = vld [vmem:[%s2496_s21 + $0xf8] sm:$0xff] }
 0x30b   : > { %1295 = vst [vmem:[%s3275_s28 + $0x78] sm:$0xff] %v1263_v11 }
 0x30d   : > { %v1209_v51 = vpop.f32.mrb[16].mxu1 }
 0x30e   : > { %v1264_v6 = vadd.f32 %v2378_v15, %v1209_v51  ;;  %v1211_v7 = vpop.f32.mrb[17].mxu1 }
 0x30f   : > { %v1265_v42 = vadd.f32 %v2379_v5, %v1211_v7  ;;  %v1213_v13 = vpop.f32.mrb[18].mxu1 }
 0x310   : > { %1296 = vst [vmem:[%s3275_s28 + $0x80] sm:$0xff] %v1264_v6  ;;  %v1266_v17 = vadd.f32 %v2380_v8, %v1213_v13  ;;  %v1215_v12 = vpop.f32.mrb[19].mxu1 }
 0x311   : > { %1297 = vst [vmem:[%s3275_s28 + $0x88] sm:$0xff] %v1265_v42  ;;  %v1267_v60 = vadd.f32 %v2381_v2, %v1215_v12 }
 0x312   : > { %1298 = vst [vmem:[%s3275_s28 + $0x90] sm:$0xff] %v1266_v17 }
 0x313   : > { %1299 = vst [vmem:[%s3275_s28 + $0x98] sm:$0xff] %v1267_v60 }
 0x315   : > { %v1219_v34 = vpop.f32.mrb[20].mxu1 }
 0x316   : > { %v1268_v39 = vadd.f32 %v2382_v4, %v1219_v34  ;;  %v1221_v3 = vpop.f32.mrb[21].mxu1 }
 0x317   : > { %v1269_v56 = vadd.f32 %v2383_v35, %v1221_v3  ;;  %v1223_v43 = vpop.f32.mrb[22].mxu1 }
 0x318   : > { %1300 = vst [vmem:[%s3275_s28 + $0xa0] sm:$0xff] %v1268_v39  ;;  %v1270_v1 = vadd.f32 %v2384_v59, %v1223_v43  ;;  %v1225_v14 = vpop.f32.mrb[23].mxu1 }
 0x319   : > { %1301 = vst [vmem:[%s3275_s28 + $0xa8] sm:$0xff] %v1269_v56  ;;  %v1271_v58 = vadd.f32 %v2385_v41, %v1225_v14 }
 0x31a   : > { %1302 = vst [vmem:[%s3275_s28 + $0xb0] sm:$0xff] %v1270_v1 }
 0x31b   : > { %1303 = vst [vmem:[%s3275_s28 + $0xb8] sm:$0xff] %v1271_v58 }
 0x31d   : > { %v1229_v40 = vpop.f32.mrb[24].mxu1 }
 0x31e   : > { %v1272_v30 = vadd.f32 %v2386_v0, %v1229_v40  ;;  %v1231_v29 = vpop.f32.mrb[25].mxu1 }
 0x31f   : > { %v1273_v24 = vadd.f32 %v2387_v50, %v1231_v29  ;;  %v1233_v16 = vpop.f32.mrb[26].mxu1 }
 0x320   : > { %1304 = vst [vmem:[%s3275_s28 + $0xc0] sm:$0xff] %v1272_v30  ;;  %v1274_v28 = vadd.f32 %v2388_v38, %v1233_v16  ;;  %v1235_v61 = vpop.f32.mrb[27].mxu1 }
 0x321   : > { %1305 = vst [vmem:[%s3275_s28 + $0xc8] sm:$0xff] %v1273_v24  ;;  %v1275_v37 = vadd.f32 %v2389_v53, %v1235_v61 }
 0x322   : > { %1306 = vst [vmem:[%s3275_s28 + $0xd0] sm:$0xff] %v1274_v28 }
 0x323   : > { %1307 = vst [vmem:[%s3275_s28 + $0xd8] sm:$0xff] %v1275_v37 }
 0x325   : > { %v1239_v18 = vpop.f32.mrb[28].mxu1 }
 0x326   : > { %v1276_v63 = vadd.f32 %v2390_v20, %v1239_v18  ;;  %v1241_v32 = vpop.f32.mrb[29].mxu1 }
 0x327   : > { %v1277_v19 = vadd.f32 %v2391_v45, %v1241_v32  ;;  %v1243_v22 = vpop.f32.mrb[30].mxu1 }
 0x328   : > { %1308 = vst [vmem:[%s3275_s28 + $0xe0] sm:$0xff] %v1276_v63  ;;  %v1278_v9 = vadd.f32 %v2392_v33, %v1243_v22  ;;  %v1245_v10 = vpop.f32.mrb[31].mxu1 }
 0x329   : > { %1309 = vst [vmem:[%s3275_s28 + $0xe8] sm:$0xff] %v1277_v19  ;;  %v1279_v46 = vadd.f32 %v2393_v62, %v1245_v10 }
 0x32a   : > { %1310 = vst [vmem:[%s3275_s28 + $0xf0] sm:$0xff] %v1278_v9 }
 0x32b   : > { %1311 = vst [vmem:[%s3275_s28 + $0xf8] sm:$0xff] %v1279_v46 }
 0x32d   : > { %v1427_v25 = vpop.f32.mrb[32].mxu1 }
 0x32e   : > { %1606 = vrot.lane.b32.xlu0 %v1427_v25, %s2445_s10  ;;  %v1429_v11 = vpop.f32.mrb[33].mxu1 }
 0x32f   : > { %v1431_v51 = vpop.f32.mrb[34].mxu1 }
 0x330   : > { %1608 = vrot.lane.b32.xlu1 %v1431_v51, %s2445_s10  ;;  %v1433_v15 = vpop.f32.mrb[35].mxu1 }
 0x332   : > { %1614 = vrot.lane.b32.xlu0 %v1429_v11, %s2445_s10 }
 0x334   : > { %1616 = vrot.lane.b32.xlu1 %v1433_v15, %s2445_s10 }
 0x335   : > { %v1437_v6 = vpop.f32.mrb[36].mxu1 }
 0x336   : > { %1610 = vrot.lane.b32.xlu0 %v1437_v6, %s2445_s10  ;;  %v1439_v7 = vpop.f32.mrb[37].mxu1 }
 0x337   : > { %v1441_v5 = vpop.f32.mrb[38].mxu1 }
 0x338   : > { %1612 = vrot.lane.b32.xlu1 %v1441_v5, %s2445_s10  ;;  %v1443_v42 = vpop.f32.mrb[39].mxu1 }
 0x33a   : > { %1618 = vrot.lane.b32.xlu0 %v1439_v7, %s2445_s10 }
 0x33c   : > { %1620 = vrot.lane.b32.xlu1 %v1443_v42, %s2445_s10 }
 0x33d   : > { %v1447_v13 = vpop.f32.mrb[40].mxu1 }
 0x33e   : > { %1646 = vrot.lane.b32.xlu0 %v1447_v13, %s2446_s11  ;;  %v1449_v8 = vpop.f32.mrb[41].mxu1 }
 0x33f   : > { %v1451_v17 = vpop.f32.mrb[42].mxu1 }
 0x340   : > { %1648 = vrot.lane.b32.xlu1 %v1451_v17, %s2446_s11  ;;  %v1453_v12 = vpop.f32.mrb[43].mxu1 }
 0x342   : > { %1654 = vrot.lane.b32.xlu0 %v1449_v8, %s2446_s11 }
 0x344   : > { %1656 = vrot.lane.b32.xlu1 %v1453_v12, %s2446_s11 }
 0x345   : > { %v1457_v2 = vpop.f32.mrb[44].mxu1 }
 0x346   : > { %1650 = vrot.lane.b32.xlu0 %v1457_v2, %s2446_s11  ;;  %v1459_v60 = vpop.f32.mrb[45].mxu1 }
 0x347   : > { %v1461_v34 = vpop.f32.mrb[46].mxu1 }
 0x348   : > { %1652 = vrot.lane.b32.xlu1 %v1461_v34, %s2446_s11  ;;  %v1463_v4 = vpop.f32.mrb[47].mxu1 }
 0x34a   : > { %1658 = vrot.lane.b32.xlu0 %v1459_v60, %s2446_s11 }
 0x34c   : > { %1660 = vrot.lane.b32.xlu1 %v1463_v4, %s2446_s11 }
 0x34d   : > { %v1467_v39 = vpop.f32.mrb[48].mxu1 }
 0x34e   : > { %1686 = vrot.lane.b32.xlu0 %v1467_v39, %s2447_s12  ;;  %v1469_v3 = vpop.f32.mrb[49].mxu1  ;;  %v3809_v39 = vld [vmem:[#allocation7_spill] sm:$0xff] }
 0x34f   : > { %v1471_v35 = vpop.f32.mrb[50].mxu1 }
 0x350   : > { %1688 = vrot.lane.b32.xlu1 %v1471_v35, %s2447_s12  ;;  %v1473_v56 = vpop.f32.mrb[51].mxu1  ;;  %v3810_v35 = vld [vmem:[#allocation9_spill] sm:$0xff] }
 0x352   : > { %1694 = vrot.lane.b32.xlu0 %v1469_v3, %s2447_s12 }
 0x354   : > { %1696 = vrot.lane.b32.xlu1 %v1473_v56, %s2447_s12 }
 0x355   : > { %v1477_v43 = vpop.f32.mrb[52].mxu1 }
 0x356   : > { %1690 = vrot.lane.b32.xlu0 %v1477_v43, %s2447_s12  ;;  %v1479_v59 = vpop.f32.mrb[53].mxu1 }
 0x357   : > { %v1481_v1 = vpop.f32.mrb[54].mxu1 }
 0x358   : > { %1692 = vrot.lane.b32.xlu1 %v1481_v1, %s2447_s12  ;;  %v1483_v14 = vpop.f32.mrb[55].mxu1 }
 0x35a   : > { %1698 = vrot.lane.b32.xlu0 %v1479_v59, %s2447_s12 }
 0x35c   : > { %1700 = vrot.lane.b32.xlu1 %v1483_v14, %s2447_s12 }
 0x35d   : > { %v1487_v41 = vpop.f32.mrb[56].mxu1 }
 0x35e   : > { %1726 = vrot.lane.b32.xlu0 %v1487_v41, %s2448_s13  ;;  %v1489_v58 = vpop.f32.mrb[57].mxu1 }
 0x35f   : > { %v1491_v40 = vpop.f32.mrb[58].mxu1 }
 0x360   : > { %1728 = vrot.lane.b32.xlu1 %v1491_v40, %s2448_s13  ;;  %v1493_v0 = vpop.f32.mrb[59].mxu1 }
 0x362   : > { %1734 = vrot.lane.b32.xlu0 %v1489_v58, %s2448_s13 }
 0x364   : > { %1736 = vrot.lane.b32.xlu1 %v1493_v0, %s2448_s13 }
 0x365   : > { %v1497_v30 = vpop.f32.mrb[60].mxu1 }
 0x366   : > { %1730 = vrot.lane.b32.xlu0 %v1497_v30, %s2448_s13  ;;  %v1499_v29 = vpop.f32.mrb[61].mxu1 }
 0x367   : > { %v1501_v50 = vpop.f32.mrb[62].mxu1 }
 0x368   : > { %1732 = vrot.lane.b32.xlu1 %v1501_v50, %s2448_s13  ;;  %v1503_v24 = vpop.f32.mrb[63].mxu1 }
 0x36a   : > { %1738 = vrot.lane.b32.xlu0 %v1499_v29, %s2448_s13 }
 0x36c   : > { %1740 = vrot.lane.b32.xlu1 %v1503_v24, %s2448_s13 }
 0x36d   : > { %v1507_v16 = vpop.f32.mrb[64].mxu1 }
 0x36e   : > { %v1509_v38 = vpop.f32.mrb[65].mxu1 }
 0x36f   : > { %v3373_v28 = vpop.f32.mrb[66].mxu1 }
 0x370   : > { %v3375_v61 = vpop.f32.mrb[67].mxu1 }
 0x375   : > { %v3377_v53 = vpop.f32.mrb[68].mxu1 }
 0x376   : > { %v3379_v37 = vpop.f32.mrb[69].mxu1 }
 0x377   : > { %v3381_v18 = vpop.f32.mrb[70].mxu1 }
 0x378   : > { %v3383_v20 = vpop.f32.mrb[71].mxu1 }
 0x37d   : > { %v1527_v63 = vpop.f32.mrb[72].mxu1 }
 0x37e   : > { %1766 = vrot.lane.b32.xlu0 %v1527_v63, %s2449_s14  ;;  %v1529_v32 = vpop.f32.mrb[73].mxu1 }
 0x37f   : > { %v1531_v45 = vpop.f32.mrb[74].mxu1 }
 0x380   : > { %1768 = vrot.lane.b32.xlu1 %v1531_v45, %s2449_s14  ;;  %v1533_v19 = vpop.f32.mrb[75].mxu1 }
 0x382   : > { %1774 = vrot.lane.b32.xlu0 %v1529_v32, %s2449_s14 }
 0x384   : > { %1776 = vrot.lane.b32.xlu1 %v1533_v19, %s2449_s14 }
 0x385   : > { %v1537_v22 = vpop.f32.mrb[76].mxu1 }
 0x386   : > { %1770 = vrot.lane.b32.xlu0 %v1537_v22, %s2449_s14  ;;  %v1539_v33 = vpop.f32.mrb[77].mxu1 }
 0x387   : > { %v1541_v9 = vpop.f32.mrb[78].mxu1 }
 0x388   : > { %1772 = vrot.lane.b32.xlu1 %v1541_v9, %s2449_s14  ;;  %v1543_v10 = vpop.f32.mrb[79].mxu1 }
 0x38a   : > { %1778 = vrot.lane.b32.xlu0 %v1539_v33, %s2449_s14 }
 0x38c   : > { %1780 = vrot.lane.b32.xlu1 %v1543_v10, %s2449_s14 }
 0x38d   : > { %v1547_v62 = vpop.f32.mrb[80].mxu1 }
 0x38e   : > { %1806 = vrot.lane.b32.xlu0 %v1547_v62, %s2450_s16  ;;  %v1549_v46 = vpop.f32.mrb[81].mxu1 }
 0x38f   : > { %v1551_v25 = vpop.f32.mrb[82].mxu1 }
 0x390   : > { %1808 = vrot.lane.b32.xlu1 %v1551_v25, %s2450_s16  ;;  %v1553_v11 = vpop.f32.mrb[83].mxu1 }
 0x392   : > { %1814 = vrot.lane.b32.xlu0 %v1549_v46, %s2450_s16 }
 0x394   : > { %1816 = vrot.lane.b32.xlu1 %v1553_v11, %s2450_s16 }
 0x395   : > { %v1557_v51 = vpop.f32.mrb[84].mxu1 }
 0x396   : > { %1810 = vrot.lane.b32.xlu0 %v1557_v51, %s2450_s16  ;;  %v1559_v15 = vpop.f32.mrb[85].mxu1 }
 0x397   : > { %v1561_v6 = vpop.f32.mrb[86].mxu1 }
 0x398   : > { %1812 = vrot.lane.b32.xlu1 %v1561_v6, %s2450_s16  ;;  %v1563_v7 = vpop.f32.mrb[87].mxu1 }
 0x39a   : > { %1818 = vrot.lane.b32.xlu0 %v1559_v15, %s2450_s16 }
 0x39c   : > { %1820 = vrot.lane.b32.xlu1 %v1563_v7, %s2450_s16 }
 0x39d   : > { %v1567_v5 = vpop.f32.mrb[88].mxu1 }
 0x39e   : > { %1846 = vrot.lane.b32.xlu0 %v1567_v5, %s2451_s19  ;;  %v1569_v42 = vpop.f32.mrb[89].mxu1 }
 0x39f   : > { %v1571_v13 = vpop.f32.mrb[90].mxu1 }
 0x3a0   : > { %v1607_v8 = vpop.permute.xlu0 %1606  ;;  %1848 = vrot.lane.b32.xlu1 %v1571_v13, %s2451_s19  ;;  %v1573_v17 = vpop.f32.mrb[91].mxu1 }
 0x3a2   : > { %v1609_v12 = vpop.permute.xlu1 %1608  ;;  %1854 = vrot.lane.b32.xlu0 %v1569_v42, %s2451_s19 }
 0x3a4   : > { %v1615_v2 = vpop.permute.xlu0 %1614  ;;  %1856 = vrot.lane.b32.xlu1 %v1573_v17, %s2451_s19 }
 0x3a5   : > { %v1622_v60 = vsel %vm682_vm0, %v1607_v8, %v1615_v2  ;;  %v1626_v34 = vsel %vm682_vm0, %v1615_v2, %v1607_v8  ;;  %v1577_v4 = vpop.f32.mrb[92].mxu1 }
 0x3a6   : > { %v1630_v3 = vmul.f32 %v1626_v34, %v3809_v39  ;;  %v1631_v56 = vmul.f32 %v1622_v60, %v3810_v35  ;;  %v1617_v43 = vpop.permute.xlu1 %1616  ;;  %1850 = vrot.lane.b32.xlu0 %v1577_v4, %s2451_s19  ;;  %v1579_v59 = vpop.f32.mrb[93].mxu1 }
 0x3a7   : > { %v1623_v1 = vsel %vm682_vm0, %v1609_v12, %v1617_v43  ;;  %v1627_v14 = vsel %vm682_vm0, %v1617_v43, %v1609_v12  ;;  %v1581_v41 = vpop.f32.mrb[94].mxu1 }
 0x3a8   : > { %v1638_v58 = vadd.f32 %v1630_v3, %v1507_v16  ;;  %v1639_v40 = vadd.f32 %v1631_v56, %v1509_v38  ;;  %v1632_v0 = vmul.f32 %v1627_v14, %v3809_v39  ;;  %v1633_v30 = vmul.f32 %v1623_v1, %v3810_v35  ;;  %v1611_v29 = vpop.permute.xlu0 %1610  ;;  %1852 = vrot.lane.b32.xlu1 %v1581_v41, %s2451_s19  ;;  %v1583_v50 = vpop.f32.mrb[95].mxu1 }
 0x3aa   : > { %v1640_v24 = vadd.f32 %v1632_v0, %v3373_v28  ;;  %v1641_v63 = vadd.f32 %v1633_v30, %v3375_v61  ;;  %v1613_v32 = vpop.permute.xlu1 %1612  ;;  %1858 = vrot.lane.b32.xlu0 %v1579_v59, %s2451_s19 }
 0x3ac   : > { %v1619_v45 = vpop.permute.xlu0 %1618  ;;  %1860 = vrot.lane.b32.xlu1 %v1583_v50, %s2451_s19 }
 0x3ad   : > { %v1624_v16 = vsel %vm682_vm0, %v1611_v29, %v1619_v45  ;;  %v1628_v38 = vsel %vm682_vm0, %v1619_v45, %v1611_v29  ;;  %v1587_v19 = vpop.f32.mrb[96].mxu1 }
 0x3ae   : > { %v1634_v22 = vmul.f32 %v1628_v38, %v3809_v39  ;;  %v1635_v33 = vmul.f32 %v1624_v16, %v3810_v35  ;;  %v1621_v28 = vpop.permute.xlu1 %1620  ;;  %1886 = vrot.lane.b32.xlu0 %v1587_v19, %s2452_s20  ;;  %v1589_v61 = vpop.f32.mrb[97].mxu1 }
 0x3af   : > { %v1625_v9 = vsel %vm682_vm0, %v1613_v32, %v1621_v28  ;;  %v1629_v10 = vsel %vm682_vm0, %v1621_v28, %v1613_v32  ;;  %v1591_v62 = vpop.f32.mrb[98].mxu1 }
 0x3b0   : > { %v1642_v46 = vadd.f32 %v1634_v22, %v3377_v53  ;;  %v1643_v25 = vadd.f32 %v1635_v33, %v3379_v37  ;;  %v1636_v11 = vmul.f32 %v1629_v10, %v3809_v39  ;;  %v1637_v51 = vmul.f32 %v1625_v9, %v3810_v35  ;;  %v1647_v15 = vpop.permute.xlu0 %1646  ;;  %1888 = vrot.lane.b32.xlu1 %v1591_v62, %s2452_s20  ;;  %v1593_v6 = vpop.f32.mrb[99].mxu1 }
 0x3b2   : > { %v1644_v7 = vadd.f32 %v1636_v11, %v3381_v18  ;;  %v1645_v5 = vadd.f32 %v1637_v51, %v3383_v20  ;;  %v1649_v42 = vpop.permute.xlu1 %1648  ;;  %1894 = vrot.lane.b32.xlu0 %v1589_v61, %s2452_s20 }
 0x3b4   : > { %v1655_v13 = vpop.permute.xlu0 %1654  ;;  %1896 = vrot.lane.b32.xlu1 %v1593_v6, %s2452_s20 }
 0x3b5   : > { %v1662_v53 = vsel %vm731_vm1, %v1647_v15, %v1655_v13  ;;  %v1666_v37 = vsel %vm731_vm1, %v1655_v13, %v1647_v15  ;;  %v1597_v8 = vpop.f32.mrb[100].mxu1 }
 0x3b6   : > { %v1670_v17 = vmul.f32 %v1666_v37, %v2772_v44  ;;  %v1671_v12 = vmul.f32 %v1662_v53, %v2782_v52  ;;  %v1657_v18 = vpop.permute.xlu1 %1656  ;;  %1890 = vrot.lane.b32.xlu0 %v1597_v8, %s2452_s20  ;;  %v1599_v20 = vpop.f32.mrb[101].mxu1 }
 0x3b7   : > { %v1663_v2 = vsel %vm731_vm1, %v1649_v42, %v1657_v18  ;;  %v1667_v60 = vsel %vm731_vm1, %v1657_v18, %v1649_v42  ;;  %v1601_v34 = vpop.f32.mrb[102].mxu1 }
 0x3b8   : > { %v1678_v4 = vadd.f32 %v1670_v17, %v1638_v58  ;;  %v1679_v39 = vadd.f32 %v1671_v12, %v1639_v40  ;;  %v1672_v3 = vmul.f32 %v1667_v60, %v2772_v44  ;;  %v1673_v35 = vmul.f32 %v1663_v2, %v2782_v52  ;;  %v1651_v56 = vpop.permute.xlu0 %1650  ;;  %1892 = vrot.lane.b32.xlu1 %v1601_v34, %s2452_s20  ;;  %v1603_v43 = vpop.f32.mrb[103].mxu1 }
 0x3ba   : > { %v1680_v59 = vadd.f32 %v1672_v3, %v1640_v24  ;;  %v1681_v1 = vadd.f32 %v1673_v35, %v1641_v63  ;;  %v1653_v14 = vpop.permute.xlu1 %1652  ;;  %1898 = vrot.lane.b32.xlu0 %v1599_v20, %s2452_s20 }
 0x3bc   : > { %v1659_v41 = vpop.permute.xlu0 %1658  ;;  %1900 = vrot.lane.b32.xlu1 %v1603_v43, %s2452_s20 }
 0x3bd   : > { %v1664_v58 = vsel %vm731_vm1, %v1651_v56, %v1659_v41  ;;  %v1668_v40 = vsel %vm731_vm1, %v1659_v41, %v1651_v56 }
 0x3be   : > { %v1674_v0 = vmul.f32 %v1668_v40, %v2772_v44  ;;  %v1675_v30 = vmul.f32 %v1664_v58, %v2782_v52  ;;  %v1661_v29 = vpop.permute.xlu1 %1660 }
 0x3bf   : > { %v1665_v50 = vsel %vm731_vm1, %v1653_v14, %v1661_v29  ;;  %v1669_v24 = vsel %vm731_vm1, %v1661_v29, %v1653_v14 }
 0x3c0   : > { %v1682_v63 = vadd.f32 %v1674_v0, %v1642_v46  ;;  %v1683_v32 = vadd.f32 %v1675_v30, %v1643_v25  ;;  %v1676_v45 = vmul.f32 %v1669_v24, %v2772_v44  ;;  %v1677_v16 = vmul.f32 %v1665_v50, %v2782_v52  ;;  %v1687_v38 = vpop.permute.xlu0 %1686 }
 0x3c2   : > { %v1684_v19 = vadd.f32 %v1676_v45, %v1644_v7  ;;  %v1685_v22 = vadd.f32 %v1677_v16, %v1645_v5  ;;  %v1689_v33 = vpop.permute.xlu1 %1688 }
 0x3c4   : > { %v1695_v28 = vpop.permute.xlu0 %1694 }
 0x3c5   : > { %v1702_v61 = vsel %vm780_vm2, %v1687_v38, %v1695_v28  ;;  %v1706_v9 = vsel %vm780_vm2, %v1695_v28, %v1687_v38 }
 0x3c6   : > { %v1710_v10 = vmul.f32 %v1706_v9, %v2807_v36  ;;  %v1711_v62 = vmul.f32 %v1702_v61, %v2809_v55  ;;  %v1697_v46 = vpop.permute.xlu1 %1696 }
 0x3c7   : > { %v1703_v44 = vsel %vm780_vm2, %v1689_v33, %v1697_v46  ;;  %v1707_v52 = vsel %vm780_vm2, %v1697_v46, %v1689_v33 }
 0x3c8   : > { %v3481_v25 = vadd.f32 %v1710_v10, %v1678_v4  ;;  %v3483_v11 = vadd.f32 %v1711_v62, %v1679_v39  ;;  %v1712_v51 = vmul.f32 %v1707_v52, %v2807_v36  ;;  %v1713_v15 = vmul.f32 %v1703_v44, %v2809_v55  ;;  %v1691_v6 = vpop.permute.xlu0 %1690 }
 0x3ca   : > { %v3487_v7 = vadd.f32 %v1712_v51, %v1680_v59  ;;  %v3489_v5 = vadd.f32 %v1713_v15, %v1681_v1  ;;  %v1693_v42 = vpop.permute.xlu1 %1692 }
 0x3cc   : > { %v1699_v13 = vpop.permute.xlu0 %1698 }
 0x3cd   : > { %v1704_v53 = vsel %vm780_vm2, %v1691_v6, %v1699_v13  ;;  %v1708_v37 = vsel %vm780_vm2, %v1699_v13, %v1691_v6 }
 0x3ce   : > { %v1714_v8 = vmul.f32 %v1708_v37, %v2807_v36  ;;  %v1715_v17 = vmul.f32 %v1704_v53, %v2809_v55  ;;  %v1701_v12 = vpop.permute.xlu1 %1700 }
 0x3cf   : > { %v1705_v18 = vsel %vm780_vm2, %v1693_v42, %v1701_v12  ;;  %v1709_v20 = vsel %vm780_vm2, %v1701_v12, %v1693_v42 }
 0x3d0   : > { %v3501_v2 = vadd.f32 %v1714_v8, %v1682_v63  ;;  %v3503_v60 = vadd.f32 %v1715_v17, %v1683_v32  ;;  %v1716_v34 = vmul.f32 %v1709_v20, %v2807_v36  ;;  %v1717_v4 = vmul.f32 %v1705_v18, %v2809_v55  ;;  %v1727_v35 = vpop.permute.xlu0 %1726 }
 0x3d2   : > { %v3507_v39 = vadd.f32 %v1716_v34, %v1684_v19  ;;  %v3509_v3 = vadd.f32 %v1717_v4, %v1685_v22  ;;  %v1729_v56 = vpop.permute.xlu1 %1728 }
 0x3d4   : > { %v1735_v43 = vpop.permute.xlu0 %1734 }
 0x3d5   : > { %v1742_v28 = vsel %vm829_vm3, %v1727_v35, %v1735_v43  ;;  %v1746_v61 = vsel %vm829_vm3, %v1735_v43, %v1727_v35 }
 0x3d6   : > { %v1737_v59 = vpop.permute.xlu1 %1736  ;;  %v1750_v46 = vmul.f32 %v1746_v61, %v2813_v23  ;;  %v1751_v44 = vmul.f32 %v1742_v28, %v2815_v26 }
 0x3d7   : > { %v1743_v10 = vsel %vm829_vm3, %v1729_v56, %v1737_v59  ;;  %v1747_v62 = vsel %vm829_vm3, %v1737_v59, %v1729_v56 }
 0x3d8   : > { %v1731_v1 = vpop.permute.xlu0 %1730  ;;  %v1752_v37 = vmul.f32 %v1747_v62, %v2813_v23  ;;  %v1753_v8 = vmul.f32 %v1743_v10, %v2815_v26 }
 0x3da   : > { %v1733_v14 = vpop.permute.xlu1 %1732 }
 0x3dc   : > { %v1739_v41 = vpop.permute.xlu0 %1738 }
 0x3dd   : > { %v1744_v52 = vsel %vm829_vm3, %v1731_v1, %v1739_v41  ;;  %v1748_v51 = vsel %vm829_vm3, %v1739_v41, %v1731_v1  ;;  %v1758_v1 = vadd.f32 %v1750_v46, %v3481_v25 }
 0x3de   : > { %v1741_v58 = vpop.permute.xlu1 %1740  ;;  %v1754_v12 = vmul.f32 %v1748_v51, %v2813_v23  ;;  %v1755_v18 = vmul.f32 %v1744_v52, %v2815_v26 }
 0x3df   : > { %v1745_v6 = vsel %vm829_vm3, %v1733_v14, %v1741_v58  ;;  %v1749_v42 = vsel %vm829_vm3, %v1741_v58, %v1733_v14  ;;  %v1759_v14 = vadd.f32 %v1751_v44, %v3483_v11 }
 0x3e0   : > { %v1756_v4 = vmul.f32 %v1749_v42, %v2813_v23  ;;  %v1757_v35 = vmul.f32 %v1745_v6, %v2815_v26  ;;  %v1763_v25 = vadd.f32 %v1755_v18, %v3503_v60 }
 0x3e2   : > { %v3568_v11 = vadd.f32 %v1756_v4, %v3507_v39  ;;  %v3571_v28 = vadd.f32 %v1757_v35, %v3509_v3 }
 0x3f0   : > { %v1767_v40 = vpop.permute.xlu0 %1766 }
 0x3f2   : > { %v1769_v0 = vpop.permute.xlu1 %1768 }
 0x3f4   : > { %v1775_v30 = vpop.permute.xlu0 %1774 }
 0x3f5   : > { %v1782_v13 = vsel %vm878_vm4, %v1767_v40, %v1775_v30  ;;  %v1786_v53 = vsel %vm878_vm4, %v1775_v30, %v1767_v40  ;;  %v1761_v30 = vadd.f32 %v1753_v8, %v3489_v5 }
 0x3f6   : > { %v1777_v29 = vpop.permute.xlu1 %1776  ;;  %v1790_v56 = vmul.f32 %v1782_v13, %v2821_v49  ;;  %v1791_v43 = vmul.f32 %v1786_v53, %v2823_v47 }
 0x3f7   : > { %v1783_v20 = vsel %vm878_vm4, %v1769_v0, %v1777_v29  ;;  %v1787_v34 = vsel %vm878_vm4, %v1777_v29, %v1769_v0  ;;  %v1760_v0 = vadd.f32 %v1752_v37, %v3487_v7  ;;  %v1762_v29 = vadd.f32 %v1754_v12, %v3501_v2 }
 0x3f8   : > { %v1771_v50 = vpop.permute.xlu0 %1770  ;;  %v1792_v41 = vmul.f32 %v1783_v20, %v2821_v49  ;;  %v1793_v58 = vmul.f32 %v1787_v34, %v2823_v47  ;;  %v1798_v61 = vadd.f32 %v1790_v56, %v1758_v1  ;;  %v1799_v10 = vadd.f32 %v1791_v43, %v1759_v14 }
 0x3fa   : > { %v3511_v36 = vpop.permute.xlu1 %1772  ;;  %v1800_v2 = vadd.f32 %v1792_v41, %v1760_v0  ;;  %v1801_v60 = vadd.f32 %v1793_v58, %v1761_v30 }
 0x3fc   : > { %v1779_v55 = vpop.permute.xlu0 %1778 }
 0x3fd   : > { %v1784_v40 = vsel %vm878_vm4, %v1771_v50, %v1779_v55  ;;  %v1788_v23 = vsel %vm878_vm4, %v1779_v55, %v1771_v50 }
 0x3fe   : > { %v1781_v24 = vpop.permute.xlu1 %1780  ;;  %v1794_v50 = vmul.f32 %v1784_v40, %v2821_v49  ;;  %v1795_v55 = vmul.f32 %v1788_v23, %v2823_v47 }
 0x3ff   : > { %v1785_v44 = vsel %vm878_vm4, %v3511_v36, %v1781_v24  ;;  %v1789_v52 = vsel %vm878_vm4, %v1781_v24, %v3511_v36 }
 0x400   : > { %v1807_v63 = vpop.permute.xlu0 %1806  ;;  %v1802_v13 = vadd.f32 %v1794_v50, %v1762_v29  ;;  %v1803_v53 = vadd.f32 %v1795_v55, %v1763_v25  ;;  %v2395_v25 = vld [vmem:[%s3771_s3 + $0x18] ss:$0 sm:$0xff] }
 0x402   : > { %v1809_v32 = vpop.permute.xlu1 %1808 }
 0x404   : > { %v1815_v45 = vpop.permute.xlu0 %1814 }
 0x405   : > { %v1822_v7 = vsel %vm927_vm5, %v1807_v63, %v1815_v45  ;;  %v1826_v5 = vsel %vm927_vm5, %v1815_v45, %v1807_v63 }
 0x406   : > { %v1817_v16 = vpop.permute.xlu1 %1816  ;;  %v1830_v51 = vmul.f32 %v1822_v7, %v2827_v31  ;;  %v1831_v6 = vmul.f32 %v1826_v5, %v2829_v21 }
 0x407   : > { %v1823_v39 = vsel %vm927_vm5, %v1809_v32, %v1817_v16  ;;  %v1827_v3 = vsel %vm927_vm5, %v1817_v16, %v1809_v32 }
 0x408   : > { %v3513_v38 = vpop.permute.xlu0 %1810  ;;  %v1832_v36 = vmul.f32 %v1823_v39, %v2827_v31  ;;  %v1833_v24 = vmul.f32 %v1827_v3, %v2829_v21  ;;  %v1838_v4 = vadd.f32 %v1830_v51, %v1798_v61  ;;  %v1839_v35 = vadd.f32 %v1831_v6, %v1799_v10 }
 0x40a   : > { %v3515_v19 = vpop.permute.xlu1 %1812  ;;  %v1840_v43 = vadd.f32 %v1832_v36, %v1800_v2 }
 0x40c   : > { %v3517_v22 = vpop.permute.xlu0 %1818 }
 0x40d   : > { %v1828_v37 = vsel %vm927_vm5, %v3517_v22, %v3513_v38 }
 0x40e   : > { %v3519_v33 = vpop.permute.xlu1 %1820  ;;  %v1835_v14 = vmul.f32 %v1828_v37, %v2829_v21 }
 0x40f   : > { %v1825_v12 = vsel %vm927_vm5, %v3515_v19, %v3519_v33  ;;  %v1829_v18 = vsel %vm927_vm5, %v3519_v33, %v3515_v19 }
 0x410   : > { %v1847_v9 = vpop.permute.xlu0 %1846  ;;  %v1836_v41 = vmul.f32 %v1825_v12, %v2827_v31  ;;  %v1837_v19 = vmul.f32 %v1829_v18, %v2829_v21 }
 0x412   : > { %v1849_v15 = vpop.permute.xlu1 %1848 }
 0x414   : > { %v1855_v17 = vpop.permute.xlu0 %1854 }
 0x415   : > { %v1862_v63 = vsel %vm976_vm6, %v1847_v9, %v1855_v17  ;;  %v1866_v45 = vsel %vm976_vm6, %v1855_v17, %v1847_v9  ;;  %v1824_v9 = vsel %vm927_vm5, %v3513_v38, %v3517_v22  ;;  %v1796_v38 = vmul.f32 %v1785_v44, %v2821_v49 }
 0x416   : > { %v1857_v59 = vpop.permute.xlu1 %1856  ;;  %v1870_v8 = vmul.f32 %v1862_v63, %v2831_v57  ;;  %v1797_v22 = vmul.f32 %v1789_v52, %v2823_v47  ;;  %v1834_v1 = vmul.f32 %v1824_v9, %v2827_v31  ;;  %v2394_v31 = vld [vmem:[%s3771_s3 + $0x10] ss:$0 sm:$0xff] }
 0x417   : > { %v1863_v32 = vsel %vm976_vm6, %v1849_v15, %v1857_v59  ;;  %v1867_v16 = vsel %vm976_vm6, %v1857_v59, %v1849_v15  ;;  %v1871_v15 = vmul.f32 %v1866_v45, %v2833_v54  ;;  %v1841_v59 = vadd.f32 %v1833_v24, %v1801_v60 }
 0x418   : > { %v1851_v26 = vpop.permute.xlu0 %1850  ;;  %v1872_v20 = vmul.f32 %v1863_v32, %v2831_v57  ;;  %v1873_v34 = vmul.f32 %v1867_v16, %v2833_v54  ;;  %v1878_v33 = vadd.f32 %v1870_v8, %v1838_v4  ;;  %v1805_v44 = vadd.f32 %v1797_v22, %v3571_v28 }
 0x419   : > { %v1879_v58 = vadd.f32 %v1871_v15, %v1839_v35  ;;  %v1843_v45 = vadd.f32 %v1835_v14, %v1803_v53 }
 0x41a   : > { %v1853_v62 = vpop.permute.xlu1 %1852  ;;  %v1880_v23 = vadd.f32 %v1872_v20, %v1840_v43  ;;  %v1881_v49 = vadd.f32 %v1873_v34, %v1841_v59 }
 0x41c   : > { %v1859_v46 = vpop.permute.xlu0 %1858 }
 0x41d   : > { %v1864_v30 = vsel %vm976_vm6, %v1851_v26, %v1859_v46  ;;  %v1868_v29 = vsel %vm976_vm6, %v1859_v46, %v1851_v26  ;;  %v1804_v46 = vadd.f32 %v1796_v38, %v3568_v11 }
 0x41e   : > { %v1861_v42 = vpop.permute.xlu1 %1860  ;;  %v1874_v52 = vmul.f32 %v1864_v30, %v2831_v57  ;;  %v1875_v63 = vmul.f32 %v1868_v29, %v2833_v54  ;;  %v2400_v30 = vld [vmem:[%s3770_s2 + $0x18] sm:$0xff]   ;;  %v2401_v29 = vld [vmem:[%s3770_s2 + $0x20] sm:$0xff]  }
 0x41f   : > { %v1865_v50 = vsel %vm976_vm6, %v1853_v62, %v1861_v42  ;;  %v1869_v55 = vsel %vm976_vm6, %v1861_v42, %v1853_v62  ;;  %v1842_v62 = vadd.f32 %v1834_v1, %v1802_v13  ;;  %v1844_v16 = vadd.f32 %v1836_v41, %v1804_v46 }
 0x420   : > { %v1887_v17 = vpop.permute.xlu0 %1886  ;;  %v1845_v42 = vadd.f32 %v1837_v19, %v1805_v44  ;;  %v1876_v36 = vmul.f32 %v1865_v50, %v2831_v57  ;;  %v1877_v24 = vmul.f32 %v1869_v55, %v2833_v54  ;;  %v2408_v44 = vld [vmem:[%s2496_s21 + $0x110] sm:$0xff] }
 0x421   : > { %v1882_v15 = vadd.f32 %v1874_v52, %v1842_v62  ;;  %v2409_v62 = vld [vmem:[%s2496_s21 + $0x1f0] sm:$0xff] }
 0x422   : > { %v1889_v56 = vpop.permute.xlu1 %1888  ;;  %v1884_v38 = vadd.f32 %v1876_v36, %v1844_v16  ;;  %v1885_v54 = vadd.f32 %v1877_v24, %v1845_v42  ;;  %v2411_v16 = vld [vmem:[%s2496_s21 + $0x1f8] sm:$0xff]  ;;  %v2412_v24 = vld [vmem:[%s2496_s21 + $0x120] sm:$0xff] }
 0x424   : > { %v1895_v40 = vpop.permute.xlu0 %1894 }
 0x425   : > { %v1902_v47 = vsel %vm1025_vm7, %v1887_v17, %v1895_v40  ;;  %v1906_v0 = vsel %vm1025_vm7, %v1895_v40, %v1887_v17  ;;  %v1883_v17 = vadd.f32 %v1875_v63, %v1843_v45 }
 0x426   : > { %v1910_v21 = vmul.f32 %v2394_v31, %v1902_v47  ;;  %v1911_v61 = vmul.f32 %v2395_v25, %v1906_v0  ;;  %v1897_v10 = vpop.permute.xlu1 %1896  ;;  %v2398_v47 = vld [vmem:[%s3770_s2 + $0x8] sm:$0xff]   ;;  %v2399_v0 = vld [vmem:[%s3770_s2 + $0x10] sm:$0xff]  }
 0x427   : > { %v1903_v26 = vsel %vm1025_vm7, %v1889_v56, %v1897_v10  ;;  %v1907_v7 = vsel %vm1025_vm7, %v1897_v10, %v1889_v56  ;;  %v2404_v10 = vld [vmem:[%s2496_s21 + $0x100] sm:$0xff] }
 0x428   : > { %v1918_v5 = vadd.f32 %v1910_v21, %v1878_v33  ;;  %v1919_v2 = vadd.f32 %v1911_v61, %v1879_v58  ;;  %v1912_v60 = vmul.f32 %v2394_v31, %v1903_v26  ;;  %v1913_v39 = vmul.f32 %v2395_v25, %v1907_v7  ;;  %v1891_v3 = vpop.permute.xlu0 %1890  ;;  %v2403_v21 = vld [vmem:[%s3770_s2 + $0x30] sm:$0xff]   ;;  %v2405_v26 = vld [vmem:[%s2496_s21 + $0x1e0] sm:$0xff] }
 0x42a   : > { %v1920_v51 = vadd.f32 %v1912_v60, %v1880_v23  ;;  %v1921_v6 = vadd.f32 %v1913_v39, %v1881_v49  ;;  %v1893_v32 = vpop.permute.xlu1 %1892  ;;  %v1926_v9 = vmax.f32 %v1918_v5, 0.0  ;;  %v1927_v37 = vmax.f32 %v1919_v2, 0.0  ;;  %v2397_v49 = vld [vmem:[%s3770_s2 + $0x38] sm:$0xff]   ;;  %v2407_v39 = vld [vmem:[%s2496_s21 + $0x1e8] sm:$0xff] }
 0x42c   : > { %v1928_v11 = vmax.f32 %v1920_v51, 0.0  ;;  %v1929_v8 = vmax.f32 %v1921_v6, 0.0  ;;  %v1899_v28 = vpop.permute.xlu0 %1898  ;;  %v2410_v6 = vld [vmem:[%s2496_s21 + $0x118] sm:$0xff] }
 0x42d   : > { %v1904_v13 = vsel %vm1025_vm7, %v1891_v3, %v1899_v28  ;;  %v1908_v53 = vsel %vm1025_vm7, %v1899_v28, %v1891_v3 }
 0x42e   : > { %v1934_v12 = vpack.c.bf16 %v1928_v11, %v1926_v9  ;;  %v1914_v18 = vmul.f32 %v2394_v31, %v1904_v13  ;;  %v1915_v20 = vmul.f32 %v2395_v25, %v1908_v53  ;;  %v1901_v34 = vpop.permute.xlu1 %1900  ;;  %v1935_v57 = vpack.c.bf16 %v1929_v8, %v1927_v37  ;;  %v2413_v11 = vld [vmem:[%s2496_s21 + $0x128] sm:$0xff]  ;;  %v2415_v53 = vld [vmem:[%s2496_s21 + $0x138] sm:$0xff] }
 0x42f   : > { %v1905_v22 = vsel %vm1025_vm7, %v1893_v32, %v1901_v34  ;;  %v1909_v4 = vsel %vm1025_vm7, %v1901_v34, %v1893_v32 }
 0x430   : > { %v1922_v35 = vadd.f32 %v1914_v18, %v1882_v15  ;;  %v1923_v56 = vadd.f32 %v1915_v20, %v1883_v17  ;;  %v1916_v43 = vmul.f32 %v2394_v31, %v1905_v22  ;;  %v1917_v59 = vmul.f32 %v2395_v25, %v1909_v4  ;;  %1938 = vmatprep.subr.bf16.mxu0 %v1935_v57  ;;  %v2402_v31 = vld [vmem:[%s3770_s2 + $0x28] sm:$0xff]   ;;  %v2414_v15 = vld [vmem:[%s2496_s21 + $0x130] sm:$0xff]  ;;  %v2416_v20 = vld [vmem:[%s2496_s21 + $0x140] sm:$0xff] }
 0x431   : > { %2297 = vmatprep.subr.bf16.mxu1 %v1935_v57  ;;  %1939 = vmatpush1.bf16.msra.mxu0 %v1934_v12  ;;  %v2418_v4 = vld [vmem:[%s2496_s21 + $0x150] sm:$0xff] }
 0x432   : > { %v1924_v1 = vadd.f32 %v1916_v43, %v1884_v38  ;;  %v1925_v14 = vadd.f32 %v1917_v59, %v1885_v54  ;;  %2299 = vmatpush1.bf16.msra.mxu1 %v1934_v12  ;;  %v1930_v41 = vmax.f32 %v1922_v35, 0.0  ;;  %v1931_v19 = vmax.f32 %v1923_v56, 0.0  ;;  %v2417_v38 = vld [vmem:[%s2496_s21 + $0x148] sm:$0xff]  ;;  %v2419_v43 = vld [vmem:[%s2496_s21 + $0x158] sm:$0xff] }
 0x434   : > { %v1932_v33 = vmax.f32 %v1924_v1, 0.0  ;;  %v1933_v58 = vmax.f32 %v1925_v14, 0.0  ;;  %v2420_v14 = vld [vmem:[%s2496_s21 + $0x160] sm:$0xff] }
 0x436   : > { %v1936_v40 = vpack.c.bf16 %v1932_v33, %v1930_v41  ;;  %v1937_v23 = vpack.c.bf16 %v1933_v58, %v1931_v19  ;;  %v2421_v33 = vld [vmem:[%s2496_s21 + $0x168] sm:$0xff] }
 0x438   : > { %1940 = vmatprep.subr.bf16.mxu0 %v1937_v23  ;;  %2298 = vmatprep.subr.bf16.mxu1 %v1937_v23  ;;  %v2422_v23 = vld [vmem:[%s2496_s21 + $0x170] sm:$0xff] }
 0x439   : > { %1941 = vmatpush1.bf16.msra.mxu0 %v1936_v40  ;;  %2300 = vmatpush1.bf16.msra.mxu1 %v1936_v40 }
 0x43c   : > { %2253 = vmatmul.mubr.msk.bf16.vlgmr.msra.gmra.mrb[72].mxu0 %vm1110_vm8, %v2396_v27  ;;  %2260 = vmatmul.mubr.msk.bf16.vlgmr.msra.gmra.mrb[104].mxu1 %vm1110_vm8, %v2397_v49 }
 0x43d   : > { %1980 = vmatprep.mubr.bf16.mxu0 %v3808_v48 }
 0x444   : > { %2254 = vmatmul.mubr.msk.bf16.gmra.mrb[76].mxu0 %vm1110_vm8, %v2398_v47  ;;  %v2423_v47 = vld [vmem:[%s2496_s21 + $0x178] sm:$0xff] }
 0x445   : > { %1990 = vmatprep.mubr.bf16.mxu0 %v3808_v48 }
 0x44c   : > { %2255 = vmatmul.mubr.msk.bf16.gmra.mrb[80].mxu0 %vm1110_vm8, %v2399_v0 }
 0x44d   : > { %2000 = vmatprep.mubr.bf16.mxu0 %v3808_v48 }
 0x454   : > { %2256 = vmatmul.mubr.msk.bf16.gmra.mrb[84].mxu0 %vm1110_vm8, %v2400_v30 }
 0x455   : > { %2010 = vmatprep.mubr.bf16.mxu0 %v3808_v48 }
 0x45c   : > { %2257 = vmatmul.mubr.msk.bf16.gmra.mrb[88].mxu0 %vm1110_vm8, %v2401_v29  ;;  %v2424_v29 = vld [vmem:[%s2496_s21 + $0x180] sm:$0xff] }
 0x45d   : > { %2020 = vmatprep.mubr.bf16.mxu0 %v3808_v48 }
 0x464   : > { %2258 = vmatmul.mubr.msk.bf16.gmra.mrb[92].mxu0 %vm1110_vm8, %v2402_v31 }
 0x465   : > { %2030 = vmatprep.mubr.bf16.mxu0 %v3808_v48  ;;  %v2406_v48 = vld [vmem:[%s2496_s21 + $0x108] sm:$0xff] }
 0x46c   : > { %2259 = vmatmul.mubr.msk.bf16.gmra.mrb[96].mxu0 %vm1110_vm8, %v2403_v21 }
 0x50f   : > { %v1972_v25 = vpop.f32.mrb[72].mxu0  ;;  %v2042_v61 = vpop.f32.mrb[104].mxu1 }
 0x510   : > { %v2051_v50 = vadd.f32 %v2404_v10, %v1972_v25  ;;  %v1974_v55 = vpop.f32.mrb[73].mxu0  ;;  %v2079_v7 = vadd.f32 %v2405_v26, %v2042_v61  ;;  %v2044_v5 = vpop.f32.mrb[105].mxu1  ;;  %v2425_v25 = vld [vmem:[%s2496_s21 + $0x188] sm:$0xff] }
 0x511   : > { %v2052_v2 = vadd.f32 %v2406_v48, %v1974_v55  ;;  %v1976_v60 = vpop.f32.mrb[74].mxu0  ;;  %v2080_v3 = vadd.f32 %v2407_v39, %v2044_v5  ;;  %v2046_v46 = vpop.f32.mrb[106].mxu1 }
 0x512   : > { %2261 = vst [vmem:[%s3275_s28 + $0x100] sm:$0xff] %v2051_v50  ;;  %v2053_v52 = vadd.f32 %v2408_v44, %v1976_v60  ;;  %v1978_v63 = vpop.f32.mrb[75].mxu0  ;;  %2289 = vst [vmem:[%s3275_s28 + $0x1e0] sm:$0xff] %v2079_v7  ;;  %v2081_v45 = vadd.f32 %v2409_v62, %v2046_v46  ;;  %v2048_v51 = vpop.f32.mrb[107].mxu1  ;;  %v2426_v50 = vld [vmem:[%s2496_s21 + $0x190] sm:$0xff]  ;;  %v2427_v7 = vld [vmem:[%s2496_s21 + $0x198] sm:$0xff] }
 0x513   : > { %2262 = vst [vmem:[%s3275_s28 + $0x108] sm:$0xff] %v2052_v2  ;;  %v2054_v32 = vadd.f32 %v2410_v6, %v1978_v63  ;;  %2290 = vst [vmem:[%s3275_s28 + $0x1e8] sm:$0xff] %v2080_v3  ;;  %v2082_v42 = vadd.f32 %v2411_v16, %v2048_v51  ;;  %v2428_v2 = vld [vmem:[%s2496_s21 + $0x1a0] sm:$0xff]  ;;  %v2429_v3 = vld [vmem:[%s2496_s21 + $0x1a8] sm:$0xff] }
 0x514   : > { %2263 = vst [vmem:[%s3275_s28 + $0x110] sm:$0xff] %v2053_v52  ;;  %2291 = vst [vmem:[%s3275_s28 + $0x1f0] sm:$0xff] %v2081_v45  ;;  %v2430_v52 = vld [vmem:[%s2496_s21 + $0x1b0] sm:$0xff]  ;;  %v2431_v45 = vld [vmem:[%s2496_s21 + $0x1b8] sm:$0xff] }
 0x515   : > { %2264 = vst [vmem:[%s3275_s28 + $0x118] sm:$0xff] %v2054_v32  ;;  %2292 = vst [vmem:[%s3275_s28 + $0x1f8] sm:$0xff] %v2082_v42  ;;  %v2432_v32 = vld [vmem:[%s2496_s21 + $0x1c0] sm:$0xff] }
 0x517   : > { %v1982_v36 = vpop.f32.mrb[76].mxu0 }
 0x518   : > { %v2055_v9 = vadd.f32 %v2412_v24, %v1982_v36  ;;  %v1984_v37 = vpop.f32.mrb[77].mxu0  ;;  %v2433_v36 = vld [vmem:[%s2496_s21 + $0x1c8] sm:$0xff] }
 0x519   : > { %v2056_v8 = vadd.f32 %v2413_v11, %v1984_v37  ;;  %v1986_v28 = vpop.f32.mrb[78].mxu0  ;;  %v2434_v37 = vld [vmem:[%s2496_s21 + $0x1d0] sm:$0xff] }
 0x51a   : > { %2265 = vst [vmem:[%s3275_s28 + $0x120] sm:$0xff] %v2055_v9  ;;  %v2057_v17 = vadd.f32 %v2414_v15, %v1986_v28  ;;  %v1988_v13 = vpop.f32.mrb[79].mxu0  ;;  %v2435_v28 = vld [vmem:[%s2496_s21 + $0x1d8] sm:$0xff] }
 0x51b   : > { %2266 = vst [vmem:[%s3275_s28 + $0x128] sm:$0xff] %v2056_v8  ;;  %v2058_v12 = vadd.f32 %v2415_v53, %v1988_v13 }
 0x51c   : > { %2267 = vst [vmem:[%s3275_s28 + $0x130] sm:$0xff] %v2057_v17 }
 0x51d   : > { %2268 = vst [vmem:[%s3275_s28 + $0x138] sm:$0xff] %v2058_v12 }
 0x51f   : > { %v1992_v18 = vpop.f32.mrb[80].mxu0 }
 0x520   : > { %v2059_v34 = vadd.f32 %v2416_v20, %v1992_v18  ;;  %v1994_v57 = vpop.f32.mrb[81].mxu0 }
 0x521   : > { %v2060_v54 = vadd.f32 %v2417_v38, %v1994_v57  ;;  %v1996_v22 = vpop.f32.mrb[82].mxu0 }
 0x522   : > { %2269 = vst [vmem:[%s3275_s28 + $0x140] sm:$0xff] %v2059_v34  ;;  %v2061_v35 = vadd.f32 %v2418_v4, %v1996_v22  ;;  %v1998_v56 = vpop.f32.mrb[83].mxu0 }
 0x523   : > { %2270 = vst [vmem:[%s3275_s28 + $0x148] sm:$0xff] %v2060_v54  ;;  %v2062_v59 = vadd.f32 %v2419_v43, %v1998_v56 }
 0x524   : > { %2271 = vst [vmem:[%s3275_s28 + $0x150] sm:$0xff] %v2061_v35 }
 0x525   : > { %2272 = vst [vmem:[%s3275_s28 + $0x158] sm:$0xff] %v2062_v59 }
 0x527   : > { %v2002_v1 = vpop.f32.mrb[84].mxu0 }
 0x528   : > { %v2063_v41 = vadd.f32 %v2420_v14, %v2002_v1  ;;  %v2004_v19 = vpop.f32.mrb[85].mxu0 }
 0x529   : > { %v2064_v58 = vadd.f32 %v2421_v33, %v2004_v19  ;;  %v2006_v40 = vpop.f32.mrb[86].mxu0 }
 0x52a   : > { %2273 = vst [vmem:[%s3275_s28 + $0x160] sm:$0xff] %v2063_v41  ;;  %v2065_v27 = vadd.f32 %v2422_v23, %v2006_v40  ;;  %v2008_v49 = vpop.f32.mrb[87].mxu0 }
 0x52b   : > { %2274 = vst [vmem:[%s3275_s28 + $0x168] sm:$0xff] %v2064_v58  ;;  %v2066_v0 = vadd.f32 %v2423_v47, %v2008_v49 }
 0x52c   : > { %2275 = vst [vmem:[%s3275_s28 + $0x170] sm:$0xff] %v2065_v27 }
 0x52d   : > { %2276 = vst [vmem:[%s3275_s28 + $0x178] sm:$0xff] %v2066_v0 }
 0x52f   : > { %v2012_v30 = vpop.f32.mrb[88].mxu0 }
 0x530   : > { %v2067_v31 = vadd.f32 %v2424_v29, %v2012_v30  ;;  %v2014_v21 = vpop.f32.mrb[89].mxu0 }
 0x531   : > { %v2068_v61 = vadd.f32 %v2425_v25, %v2014_v21  ;;  %v2016_v10 = vpop.f32.mrb[90].mxu0 }
 0x532   : > { %2277 = vst [vmem:[%s3275_s28 + $0x180] sm:$0xff] %v2067_v31  ;;  %v2069_v55 = vadd.f32 %v2426_v50, %v2016_v10  ;;  %v2018_v26 = vpop.f32.mrb[91].mxu0 }
 0x533   : > { %2278 = vst [vmem:[%s3275_s28 + $0x188] sm:$0xff] %v2068_v61  ;;  %v2070_v5 = vadd.f32 %v2427_v7, %v2018_v26 }
 0x534   : > { %2279 = vst [vmem:[%s3275_s28 + $0x190] sm:$0xff] %v2069_v55 }
 0x535   : > { %2280 = vst [vmem:[%s3275_s28 + $0x198] sm:$0xff] %v2070_v5 }
 0x537   : > { %v2022_v48 = vpop.f32.mrb[92].mxu0 }
 0x538   : > { %v2071_v60 = vadd.f32 %v2428_v2, %v2022_v48  ;;  %v2024_v39 = vpop.f32.mrb[93].mxu0 }
 0x539   : > { %v2072_v46 = vadd.f32 %v2429_v3, %v2024_v39  ;;  %v2026_v44 = vpop.f32.mrb[94].mxu0 }
 0x53a   : > { %2281 = vst [vmem:[%s3275_s28 + $0x1a0] sm:$0xff] %v2071_v60  ;;  %v2073_v63 = vadd.f32 %v2430_v52, %v2026_v44  ;;  %v2028_v62 = vpop.f32.mrb[95].mxu0 }
 0x53b   : > { %2282 = vst [vmem:[%s3275_s28 + $0x1a8] sm:$0xff] %v2072_v46  ;;  %v2074_v51 = vadd.f32 %v2431_v45, %v2028_v62 }
 0x53c   : > { %2283 = vst [vmem:[%s3275_s28 + $0x1b0] sm:$0xff] %v2073_v63 }
 0x53d   : > { %2284 = vst [vmem:[%s3275_s28 + $0x1b8] sm:$0xff] %v2074_v51 }
 0x53f   : > { %v2032_v6 = vpop.f32.mrb[96].mxu0 }
 0x540   : > { %v2075_v16 = vadd.f32 %v2432_v32, %v2032_v6  ;;  %v2034_v42 = vpop.f32.mrb[97].mxu0 }
 0x541   : > { %v2076_v24 = vadd.f32 %v2433_v36, %v2034_v42  ;;  %v2036_v9 = vpop.f32.mrb[98].mxu0 }
 0x542   : > { %2285 = vst [vmem:[%s3275_s28 + $0x1c0] sm:$0xff] %v2075_v16  ;;  %v2077_v11 = vadd.f32 %v2434_v37, %v2036_v9  ;;  %v2038_v8 = vpop.f32.mrb[99].mxu0 }
 0x543   : > { %2286 = vst [vmem:[%s3275_s28 + $0x1c8] sm:$0xff] %v2076_v24  ;;  %v2078_v15 = vadd.f32 %v2435_v28, %v2038_v8 }
 0x544   : > { %2287 = vst [vmem:[%s3275_s28 + $0x1d0] sm:$0xff] %v2077_v11 }
 0x545   : > { %2288 = vst [vmem:[%s3275_s28 + $0x1d8] sm:$0xff] %v2078_v15 }
 0x546 PF: > { %s14_s15 = sadd.s32 1, %s2442_s15  }
 0x547   : > { %p11_p4 = scmp.ge.s32.totalorder %s14_s15, 6  }
 0x549   :  { %13 = sbr.rel (!%p11_p4) target bundleno = 1 (0x1), region = 68 }

</bundles_post_ra>
